<compile_context>
chip_gen: v7x
topology: tpu7x:2x2x1
jax: 0.10.0
libtpu: 0.0.40
codegen_flags: <defaults>
</compile_context>

<pallas_src>
import jax
import jax.numpy as jnp
from jax.experimental import pallas as pl
from jax.experimental.pallas import tpu as pltpu

NUM_HIGHWAY_LAYERS = 10
BN_EPS = 1e-5
LANE = 128
MAX_TILE_L = 2048                       # L-reduction tile (lane axis of w1 tile is MP)
VMEM_LIMIT_BYTES = 48 * 1024 * 1024     # headroom below v7x's 64 MiB physical VMEM


def _round_up(x, m):
    return ((x + m - 1) // m) * m


def mrna_net_kernel(mask_ref, x_ref, w1_ref, b1_ref, gamma_ref, beta_ref,
                    wf_hbm, bf_hbm, out_ref,
                    acc_ref, wf_vmem, bf_vmem, sems):
    k = pl.program_id(0)
    num_k = pl.num_programs(0)

    # --- grid step 0: zero the accumulator and kick off the highway-weight DMA
    #     (it completes while the L-reduction streams w1 tiles through VMEM) ---
    @pl.when(k == 0)
    def _():
        acc_ref[...] = jnp.zeros_like(acc_ref)
        pltpu.make_async_copy(wf_hbm, wf_vmem, sems.at[0]).start()
        pltpu.make_async_copy(bf_hbm, bf_vmem, sems.at[1]).start()

    # --- streaming phase: accumulate x_tile @ w1_tile (bf16 MXU, f32 acc).
    #     The row mask is hoisted to the epilogue: (x*mask)@W == mask*(x@W). ---
    acc_ref[...] += jnp.dot(x_ref[...].astype(jnp.bfloat16), w1_ref[...],
                            preferred_element_type=jnp.float32)

    # --- epilogue on the last L tile: mask + bias + BN + highway + sigmoid ---
    @pl.when(k == num_k - 1)
    def _():
        # Highway weights must be resident before the highway loop.
        pltpu.make_async_copy(wf_hbm, wf_vmem, sems.at[0]).wait()
        pltpu.make_async_copy(bf_hbm, bf_vmem, sems.at[1]).wait()

        # Mask multiplies the Linear output BEFORE the bias is added
        # (PyTorch masks the input, not the bias).
        h = acc_ref[...] * mask_ref[...] + b1_ref[...]

        # BatchNorm1d training-mode forward, two-pass (centered) statistics,
        # biased variance (matches PyTorch's normalization denominator).
        inv_b = 1.0 / h.shape[0]
        mean = jnp.sum(h, axis=0, keepdims=True) * inv_b
        c = h - mean
        var = jnp.sum(c * c, axis=0, keepdims=True) * inv_b
        h = c * jax.lax.rsqrt(var + BN_EPS) * gamma_ref[...] + beta_ref[...]

        mp = h.shape[1]  # padded (lane-dense) feature width

        def highway_layer(l, h):
            # fused [gate | nonlin | linear] projection: one MXU matmul/layer
            z = jnp.dot(h.astype(jnp.bfloat16), wf_vmem[l],
                        preferred_element_type=jnp.float32) + bf_vmem[l]
            gate = jax.nn.sigmoid(z[:, :mp])
            nonlin = jnp.maximum(z[:, mp:2 * mp], 0.0)
            lin = z[:, 2 * mp:]
            return gate * nonlin + (1.0 - gate) * lin

        # Fully unrolled: 10 tiny latency-bound layers; gives the scheduler
        # visibility to overlap weight loads with MXU drain / EUP sigmoid.
        h = jax.lax.fori_loop(0, NUM_HIGHWAY_LAYERS, highway_layer, h,
                              unroll=True)

        # TODO(synk): nn.Dropout(p=0.3) uses torch's RNG in training mode;
        # implemented as the eval-mode identity here.
        out_ref[...] = jax.nn.sigmoid(h)


def mrna_net_forward(mrna_input, prepared, mask):
    """mrna_input: (B, mrna_length) f32, mask: (B, 1) f32, prepared: dict."""
    B, L = mrna_input.shape
    M = prepared["m_length"]
    L_pad, MP = prepared["w1"].shape
    tile_l = prepared["tile_l"]
    grid_l = L_pad // tile_l
    H = NUM_HIGHWAY_LAYERS

    x = mrna_input
    if L_pad != L:
        x = jnp.pad(x, ((0, 0), (0, L_pad - L)))

    def full2d(shape):
        return pl.BlockSpec(shape, lambda k: (0, 0))

    out = pl.pallas_call(
        mrna_net_kernel,
        out_shape=jax.ShapeDtypeStruct((B, MP), jnp.float32),
        grid=(grid_l,),
        in_specs=[
            full2d((B, 1)),                                   # mask
            pl.BlockSpec((B, tile_l), lambda k: (0, k)),      # x, L-tiled
            pl.BlockSpec((tile_l, MP), lambda k: (k, 0)),     # w1, L-tiled
            full2d((1, MP)),                                  # b1
            full2d((1, MP)),                                  # gamma
            full2d((1, MP)),                                  # beta
            pl.BlockSpec(memory_space=pl.ANY),                # fused highway W (manual DMA)
            pl.BlockSpec(memory_space=pl.ANY),                # fused highway b (manual DMA)
        ],
        out_specs=pl.BlockSpec((B, MP), lambda k: (0, 0)),
        scratch_shapes=[
            pltpu.VMEM((B, MP), jnp.float32),                 # f32 accumulator
            pltpu.VMEM((H, MP, 3 * MP), jnp.bfloat16),        # highway W (single-buffered)
            pltpu.VMEM((H, 1, 3 * MP), jnp.float32),          # highway b
            pltpu.SemaphoreType.DMA((2,)),                    # wf / bf DMA sems
        ],
        compiler_params=pltpu.CompilerParams(
            dimension_semantics=("arbitrary",),
            vmem_limit_bytes=VMEM_LIMIT_BYTES),
    )(mask, x,
      prepared["w1"], prepared["b1"], prepared["gamma"], prepared["beta"],
      prepared["wf"], prepared["bf"])
    return out[:, :M]


def init_params(key, mrna_length, m_length):
    """Deterministic synthetic init (PyTorch-style uniform fan-in bounds).
    Logical (unpadded) f32 shapes; Linear weights stored as (in, out) = W.T."""
    ks = jax.random.split(key, 8)

    def unif(k, shape, fan_in):
        bound = 1.0 / jnp.sqrt(fan_in)
        return jax.random.uniform(k, shape, jnp.float32, -bound, bound)

    H, M, L = NUM_HIGHWAY_LAYERS, m_length, mrna_length
    return {
        "w1": unif(ks[0], (L, M), L),
        "b1": unif(ks[1], (1, M), L),
        "gamma": jnp.ones((1, M), jnp.float32),   # BatchNorm1d affine init
        "beta": jnp.zeros((1, M), jnp.float32),
        "wg": unif(ks[2], (H, M, M), M),
        "bg": unif(ks[3], (H, 1, M), M),
        "wn": unif(ks[4], (H, M, M), M),
        "bn": unif(ks[5], (H, 1, M), M),
        "wl": unif(ks[6], (H, M, M), M),
        "bl": unif(ks[7], (H, 1, M), M),
    }


def _choose_l_tiling(L):
    l128 = _round_up(L, LANE)
    tile_l = min(l128, MAX_TILE_L)
    l_pad = _round_up(l128, tile_l)
    return tile_l, l_pad


def prepare_params(params):
    """Pad the feature axis to a multiple of 128 (lane dense), fuse the three
    highway projections into one (H, MP, 3*MP) weight, cast matmul weights to
    bf16. Padded weight rows/cols are zero so padded lanes stay exactly 0."""
    L, M = params["w1"].shape
    MP = _round_up(M, LANE)
    tile_l, l_pad = _choose_l_tiling(L)

    def pad2(a, rows, cols):
        return jnp.pad(a, ((0, rows - a.shape[0]), (0, cols - a.shape[1])))

    def pad_hw(w):   # (H, M, M) -> (H, MP, MP)
        return jnp.pad(w, ((0, 0), (0, MP - M), (0, MP - M)))

    def pad_hb(b):   # (H, 1, M) -> (H, 1, MP)
        return jnp.pad(b, ((0, 0), (0, 0), (0, MP - M)))

    wf = jnp.concatenate(
        [pad_hw(params["wg"]), pad_hw(params["wn"]), pad_hw(params["wl"])],
        axis=-1).astype(jnp.bfloat16)
    bf = jnp.concatenate(
        [pad_hb(params["bg"]), pad_hb(params["bn"]), pad_hb(params["bl"])],
        axis=-1).astype(jnp.float32)

    return {
        "w1": pad2(params["w1"], l_pad, MP).astype(jnp.bfloat16),
        "b1": pad2(params["b1"], 1, MP),
        "gamma": pad2(params["gamma"], 1, MP),
        "beta": pad2(params["beta"], 1, MP),
        "wf": wf,
        "bf": bf,
        "m_length": M,
        "tile_l": tile_l,
    }


if __name__ == "__main__":
    B, MRNA_LEN, M_LEN = 8, 64, 32

    key = jax.random.PRNGKey(0)
    k_x, k_mask, k_params = jax.random.split(key, 3)

    mrna_input = jax.random.normal(k_x, (B, MRNA_LEN), jnp.float32)
    # row mask: 1 if rand > 0.1 else 0 (same rule as MrnaNet._make_mask)
    mask = (jax.random.uniform(k_mask, (B, 1)) > 0.1).astype(jnp.float32)

    params = init_params(k_params, MRNA_LEN, M_LEN)
    prepared = prepare_params(params)

    out = mrna_net_forward(mrna_input, prepared, mask)
    jax.block_until_ready(out)
    assert out.shape == (B, M_LEN) and out.dtype == jnp.float32
    assert bool(jnp.all(jnp.isfinite(out)))
    print("KERNEL_OK")
</pallas_src>

<mosaic_0001>
module attributes {stable_mosaic.version = 11 : i64} {
  func.func @mrna_net_kernel(%arg0: i32, %arg1: memref<8x1xf32, #tpu.memory_space<vmem>>, %arg2: memref<8x128xf32, #tpu.memory_space<vmem>>, %arg3: memref<128x128xbf16, #tpu.memory_space<vmem>>, %arg4: memref<1x128xf32, #tpu.memory_space<vmem>>, %arg5: memref<1x128xf32, #tpu.memory_space<vmem>>, %arg6: memref<1x128xf32, #tpu.memory_space<vmem>>, %arg7: memref<10x128x384xbf16, #tpu.memory_space<any>>, %arg8: memref<10x1x384xf32, #tpu.memory_space<any>>, %arg9: memref<8x128xf32, #tpu.memory_space<vmem>>, %arg10: memref<8x128xf32, #tpu.memory_space<vmem>>, %arg11: memref<10x128x384xbf16, #tpu.memory_space<vmem>>, %arg12: memref<10x1x384xf32, #tpu.memory_space<vmem>>, %arg13: memref<2x!tpu.dma_semaphore, #tpu.memory_space<semaphore_mem>>) attributes {dimension_semantics = [#tpu.dimension_semantics<arbitrary>], iteration_bounds = array<i64: 1>, scalar_prefetch = 0 : i64, scratch_operands = 4 : i64, tpu.core_type = #tpu.core_type<tc>, window_params = [{pipeline_mode = #tpu.pipeline_mode<synchronous>, transform_indices = @transform_0, window_bounds = array<i64: 8, 1>}, {transform_indices = @transform_1, window_bounds = array<i64: 8, 128>}, {transform_indices = @transform_2, window_bounds = array<i64: 128, 128>}, {pipeline_mode = #tpu.pipeline_mode<synchronous>, transform_indices = @transform_3, window_bounds = array<i64: 1, 128>}, {pipeline_mode = #tpu.pipeline_mode<synchronous>, transform_indices = @transform_4, window_bounds = array<i64: 1, 128>}, {pipeline_mode = #tpu.pipeline_mode<synchronous>, transform_indices = @transform_5, window_bounds = array<i64: 1, 128>}, {}, {}, {pipeline_mode = #tpu.pipeline_mode<synchronous>, transform_indices = @transform_8, window_bounds = array<i64: 8, 128>}]} {
    %c0_i32 = arith.constant 0 : i32
    %0 = arith.cmpi eq, %arg0, %c0_i32 : i32
    %1 = arith.extui %0 : i1 to i32
    %c0_i32_0 = arith.constant 0 : i32
    %2 = arith.cmpi ne, %1, %c0_i32_0 : i32
    scf.if %2 {
      %cst_10 = arith.constant 0.000000e+00 : f32
      %13 = vector.broadcast %cst_10 : f32 to vector<8x128xf32>
      %c0_11 = arith.constant 0 : index
      %c0_12 = arith.constant 0 : index
      %14 = vector.load %arg10[%c0_11, %c0_12] : memref<8x128xf32, #tpu.memory_space<vmem>>, vector<8x128xf32>
      tpu.vector_store %arg10[%c0_11, %c0_12], %13 {strides = array<i32>} : memref<8x128xf32, #tpu.memory_space<vmem>>, vector<8x128xf32>,
      %c0_i32_13 = arith.constant 0 : i32
      %15 = tpu.memref_slice %arg13[%c0_i32_13] : memref<2x!tpu.dma_semaphore, #tpu.memory_space<semaphore_mem>> -> memref<1x!tpu.dma_semaphore, #tpu.memory_space<semaphore_mem>>
      %16 = tpu.memref_squeeze %15 : memref<1x!tpu.dma_semaphore, #tpu.memory_space<semaphore_mem>> -> memref<!tpu.dma_semaphore, #tpu.memory_space<semaphore_mem>>
      tpu.enqueue_dma source(%arg7 : memref<10x128x384xbf16, #tpu.memory_space<any>>) target(%arg11 : memref<10x128x384xbf16, #tpu.memory_space<vmem>>) target_semaphore(%16 : memref<!tpu.dma_semaphore, #tpu.memory_space<semaphore_mem>>)
      %c1_i32 = arith.constant 1 : i32
      %17 = tpu.memref_slice %arg13[%c1_i32] : memref<2x!tpu.dma_semaphore, #tpu.memory_space<semaphore_mem>> -> memref<1x!tpu.dma_semaphore, #tpu.memory_space<semaphore_mem>>
      %18 = tpu.memref_squeeze %17 : memref<1x!tpu.dma_semaphore, #tpu.memory_space<semaphore_mem>> -> memref<!tpu.dma_semaphore, #tpu.memory_space<semaphore_mem>>
      tpu.enqueue_dma source(%arg8 : memref<10x1x384xf32, #tpu.memory_space<any>>) target(%arg12 : memref<10x1x384xf32, #tpu.memory_space<vmem>>) target_semaphore(%18 : memref<!tpu.dma_semaphore, #tpu.memory_space<semaphore_mem>>)
    } else {
    }
    %c0 = arith.constant 0 : index
    %c0_1 = arith.constant 0 : index
    %3 = vector.load %arg10[%c0, %c0_1] : memref<8x128xf32, #tpu.memory_space<vmem>>, vector<8x128xf32>
    %c0_2 = arith.constant 0 : index
    %c0_3 = arith.constant 0 : index
    %4 = vector.load %arg2[%c0_2, %c0_3] : memref<8x128xf32, #tpu.memory_space<vmem>>, vector<8x128xf32>
    %5 = arith.truncf %4 : vector<8x128xf32> to vector<8x128xbf16>
    %c0_4 = arith.constant 0 : index
    %c0_5 = arith.constant 0 : index
    %6 = vector.load %arg3[%c0_4, %c0_5] : memref<128x128xbf16, #tpu.memory_space<vmem>>, vector<128x128xbf16>
    %cst = arith.constant dense<0.000000e+00> : vector<8x128xf32>
    %7 = tpu.matmul %5, %6, %cst {dimension_numbers = #tpu.dot_dimension_numbers<[1], [0], [0], [1], [0, 0, 1, 1], [], []>} : vector<8x128xbf16>, vector<128x128xbf16>, vector<8x128xf32> -> vector<8x128xf32>
    %8 = arith.addf %3, %7 : vector<8x128xf32>
    %c0_6 = arith.constant 0 : index
    %c0_7 = arith.constant 0 : index
    %9 = vector.load %arg10[%c0_6, %c0_7] : memref<8x128xf32, #tpu.memory_space<vmem>>, vector<8x128xf32>
    tpu.vector_store %arg10[%c0_6, %c0_7], %8 {strides = array<i32>} : memref<8x128xf32, #tpu.memory_space<vmem>>, vector<8x128xf32>,
    %c0_i32_8 = arith.constant 0 : i32
    %10 = arith.cmpi eq, %arg0, %c0_i32_8 : i32
    %11 = arith.extui %10 : i1 to i32
    %c0_i32_9 = arith.constant 0 : i32
    %12 = arith.cmpi ne, %11, %c0_i32_9 : i32
    scf.if %12 {
      %c0_i32_10 = arith.constant 0 : i32
      %13 = tpu.memref_slice %arg13[%c0_i32_10] : memref<2x!tpu.dma_semaphore, #tpu.memory_space<semaphore_mem>> -> memref<1x!tpu.dma_semaphore, #tpu.memory_space<semaphore_mem>>
      %14 = tpu.memref_squeeze %13 : memref<1x!tpu.dma_semaphore, #tpu.memory_space<semaphore_mem>> -> memref<!tpu.dma_semaphore, #tpu.memory_space<semaphore_mem>>
      tpu.wait_dma2 semaphore(%14 : memref<!tpu.dma_semaphore, #tpu.memory_space<semaphore_mem>>) src(%arg7 : memref<10x128x384xbf16, #tpu.memory_space<any>>) dst(%arg11 : memref<10x128x384xbf16, #tpu.memory_space<vmem>>)
      %c1_i32 = arith.constant 1 : i32
      %15 = tpu.memref_slice %arg13[%c1_i32] : memref<2x!tpu.dma_semaphore, #tpu.memory_space<semaphore_mem>> -> memref<1x!tpu.dma_semaphore, #tpu.memory_space<semaphore_mem>>
      %16 = tpu.memref_squeeze %15 : memref<1x!tpu.dma_semaphore, #tpu.memory_space<semaphore_mem>> -> memref<!tpu.dma_semaphore, #tpu.memory_space<semaphore_mem>>
      tpu.wait_dma2 semaphore(%16 : memref<!tpu.dma_semaphore, #tpu.memory_space<semaphore_mem>>) src(%arg8 : memref<10x1x384xf32, #tpu.memory_space<any>>) dst(%arg12 : memref<10x1x384xf32, #tpu.memory_space<vmem>>)
      %c0_11 = arith.constant 0 : index
      %c0_12 = arith.constant 0 : index
      %17 = vector.load %arg10[%c0_11, %c0_12] : memref<8x128xf32, #tpu.memory_space<vmem>>, vector<8x128xf32>
      %c0_13 = arith.constant 0 : index
      %c0_14 = arith.constant 0 : index
      %18 = vector.load %arg1[%c0_13, %c0_14] : memref<8x1xf32, #tpu.memory_space<vmem>>, vector<8x1xf32>
      %19 = vector.broadcast %18 : vector<8x1xf32> to vector<8x128xf32>
      %20 = arith.mulf %17, %19 : vector<8x128xf32>
      %c0_15 = arith.constant 0 : index
      %c0_16 = arith.constant 0 : index
      %21 = vector.load %arg4[%c0_15, %c0_16] : memref<1x128xf32, #tpu.memory_space<vmem>>, vector<1x128xf32>
      %22 = vector.broadcast %21 : vector<1x128xf32> to vector<8x128xf32>
      %23 = arith.addf %20, %22 : vector<8x128xf32>
      %cst_17 = arith.constant dense<0.000000e+00> : vector<128xf32>
      %24 = vector.multi_reduction <add>, %23, %cst_17 [0] : vector<8x128xf32> to vector<128xf32>
      %25 = vector.shape_cast %24 : vector<128xf32> to vector<1x128xf32>
      %cst_18 = arith.constant 1.250000e-01 : f32
      %26 = vector.broadcast %cst_18 : f32 to vector<1x128xf32>
      %27 = arith.mulf %25, %26 : vector<1x128xf32>
      %28 = vector.broadcast %27 : vector<1x128xf32> to vector<8x128xf32>
      %29 = arith.subf %23, %28 : vector<8x128xf32>
      %30 = arith.mulf %29, %29 : vector<8x128xf32>
      %cst_19 = arith.constant dense<0.000000e+00> : vector<128xf32>
      %31 = vector.multi_reduction <add>, %30, %cst_19 [0] : vector<8x128xf32> to vector<128xf32>
      %32 = vector.shape_cast %31 : vector<128xf32> to vector<1x128xf32>
      %cst_20 = arith.constant 1.250000e-01 : f32
      %33 = vector.broadcast %cst_20 : f32 to vector<1x128xf32>
      %34 = arith.mulf %32, %33 : vector<1x128xf32>
      %cst_21 = arith.constant 9.99999974E-6 : f32
      %35 = vector.broadcast %cst_21 : f32 to vector<1x128xf32>
      %36 = arith.addf %34, %35 : vector<1x128xf32>
      %37 = math.rsqrt %36 : vector<1x128xf32>
      %38 = vector.broadcast %37 : vector<1x128xf32> to vector<8x128xf32>
      %39 = arith.mulf %29, %38 : vector<8x128xf32>
      %c0_22 = arith.constant 0 : index
      %c0_23 = arith.constant 0 : index
      %40 = vector.load %arg5[%c0_22, %c0_23] : memref<1x128xf32, #tpu.memory_space<vmem>>, vector<1x128xf32>
      %41 = vector.broadcast %40 : vector<1x128xf32> to vector<8x128xf32>
      %42 = arith.mulf %39, %41 : vector<8x128xf32>
      %c0_24 = arith.constant 0 : index
      %c0_25 = arith.constant 0 : index
      %43 = vector.load %arg6[%c0_24, %c0_25] : memref<1x128xf32, #tpu.memory_space<vmem>>, vector<1x128xf32>
      %44 = vector.broadcast %43 : vector<1x128xf32> to vector<8x128xf32>
      %45 = arith.addf %42, %44 : vector<8x128xf32>
      %c0_i32_26 = arith.constant 0 : i32
      %46 = arith.truncf %45 : vector<8x128xf32> to vector<8x128xbf16>
      %47 = arith.index_cast %c0_i32_26 : i32 to index
      %c0_27 = arith.constant 0 : index
      %c0_28 = arith.constant 0 : index
      %48 = vector.load %arg11[%47, %c0_27, %c0_28] : memref<10x128x384xbf16, #tpu.memory_space<vmem>>, vector<1x128x384xbf16>
      %49 = vector.shape_cast %48 : vector<1x128x384xbf16> to vector<128x384xbf16>
      %cst_29 = arith.constant dense<0.000000e+00> : vector<8x384xf32>
      %50 = tpu.matmul %46, %49, %cst_29 {dimension_numbers = #tpu.dot_dimension_numbers<[1], [0], [0], [1], [0, 0, 1, 1], [], []>} : vector<8x128xbf16>, vector<128x384xbf16>, vector<8x384xf32> -> vector<8x384xf32>
      %51 = arith.index_cast %c0_i32_26 : i32 to index
      %c0_30 = arith.constant 0 : index
      %c0_31 = arith.constant 0 : index
      %52 = vector.load %arg12[%51, %c0_30, %c0_31] : memref<10x1x384xf32, #tpu.memory_space<vmem>>, vector<1x1x384xf32>
      %53 = vector.shape_cast %52 : vector<1x1x384xf32> to vector<1x384xf32>
      %54 = vector.broadcast %53 : vector<1x384xf32> to vector<8x384xf32>
      %55 = arith.addf %50, %54 : vector<8x384xf32>
      %56 = vector.extract_strided_slice %55 {offsets = [0, 0], sizes = [8, 128], strides = [1, 1]} : vector<8x384xf32> to vector<8x128xf32>
      %57 = arith.negf %56 : vector<8x128xf32>
      %58 = math.exp %57 : vector<8x128xf32>
      %cst_32 = arith.constant 1.000000e+00 : f32
      %59 = vector.broadcast %cst_32 : f32 to vector<8x128xf32>
      %60 = arith.addf %59, %58 : vector<8x128xf32>
      %61 = arith.divf %59, %60 : vector<8x128xf32>
      %62 = vector.extract_strided_slice %55 {offsets = [0, 128], sizes = [8, 128], strides = [1, 1]} : vector<8x384xf32> to vector<8x128xf32>
      %cst_33 = arith.constant 0.000000e+00 : f32
      %63 = vector.broadcast %cst_33 : f32 to vector<8x128xf32>
      %64 = arith.maximumf %62, %63 : vector<8x128xf32>
      %65 = vector.extract_strided_slice %55 {offsets = [0, 256], sizes = [8, 128], strides = [1, 1]} : vector<8x384xf32> to vector<8x128xf32>
      %66 = arith.mulf %61, %64 : vector<8x128xf32>
      %cst_34 = arith.constant 1.000000e+00 : f32
      %67 = vector.broadcast %cst_34 : f32 to vector<8x128xf32>
      %68 = arith.subf %67, %61 : vector<8x128xf32>
      %69 = arith.mulf %68, %65 : vector<8x128xf32>
      %70 = arith.addf %66, %69 : vector<8x128xf32>
      %c1_i32_35 = arith.constant 1 : i32
      %71 = arith.truncf %70 : vector<8x128xf32> to vector<8x128xbf16>
      %72 = arith.index_cast %c1_i32_35 : i32 to index
      %c0_36 = arith.constant 0 : index
      %c0_37 = arith.constant 0 : index
      %73 = vector.load %arg11[%72, %c0_36, %c0_37] : memref<10x128x384xbf16, #tpu.memory_space<vmem>>, vector<1x128x384xbf16>
      %74 = vector.shape_cast %73 : vector<1x128x384xbf16> to vector<128x384xbf16>
      %cst_38 = arith.constant dense<0.000000e+00> : vector<8x384xf32>
      %75 = tpu.matmul %71, %74, %cst_38 {dimension_numbers = #tpu.dot_dimension_numbers<[1], [0], [0], [1], [0, 0, 1, 1], [], []>} : vector<8x128xbf16>, vector<128x384xbf16>, vector<8x384xf32> -> vector<8x384xf32>
      %76 = arith.index_cast %c1_i32_35 : i32 to index
      %c0_39 = arith.constant 0 : index
      %c0_40 = arith.constant 0 : index
      %77 = vector.load %arg12[%76, %c0_39, %c0_40] : memref<10x1x384xf32, #tpu.memory_space<vmem>>, vector<1x1x384xf32>
      %78 = vector.shape_cast %77 : vector<1x1x384xf32> to vector<1x384xf32>
      %79 = vector.broadcast %78 : vector<1x384xf32> to vector<8x384xf32>
      %80 = arith.addf %75, %79 : vector<8x384xf32>
      %81 = vector.extract_strided_slice %80 {offsets = [0, 0], sizes = [8, 128], strides = [1, 1]} : vector<8x384xf32> to vector<8x128xf32>
      %82 = arith.negf %81 : vector<8x128xf32>
      %83 = math.exp %82 : vector<8x128xf32>
      %cst_41 = arith.constant 1.000000e+00 : f32
      %84 = vector.broadcast %cst_41 : f32 to vector<8x128xf32>
      %85 = arith.addf %84, %83 : vector<8x128xf32>
      %86 = arith.divf %84, %85 : vector<8x128xf32>
      %87 = vector.extract_strided_slice %80 {offsets = [0, 128], sizes = [8, 128], strides = [1, 1]} : vector<8x384xf32> to vector<8x128xf32>
      %cst_42 = arith.constant 0.000000e+00 : f32
      %88 = vector.broadcast %cst_42 : f32 to vector<8x128xf32>
      %89 = arith.maximumf %87, %88 : vector<8x128xf32>
      %90 = vector.extract_strided_slice %80 {offsets = [0, 256], sizes = [8, 128], strides = [1, 1]} : vector<8x384xf32> to vector<8x128xf32>
      %91 = arith.mulf %86, %89 : vector<8x128xf32>
      %cst_43 = arith.constant 1.000000e+00 : f32
      %92 = vector.broadcast %cst_43 : f32 to vector<8x128xf32>
      %93 = arith.subf %92, %86 : vector<8x128xf32>
      %94 = arith.mulf %93, %90 : vector<8x128xf32>
      %95 = arith.addf %91, %94 : vector<8x128xf32>
      %c2_i32 = arith.constant 2 : i32
      %96 = arith.truncf %95 : vector<8x128xf32> to vector<8x128xbf16>
      %97 = arith.index_cast %c2_i32 : i32 to index
      %c0_44 = arith.constant 0 : index
      %c0_45 = arith.constant 0 : index
      %98 = vector.load %arg11[%97, %c0_44, %c0_45] : memref<10x128x384xbf16, #tpu.memory_space<vmem>>, vector<1x128x384xbf16>
      %99 = vector.shape_cast %98 : vector<1x128x384xbf16> to vector<128x384xbf16>
      %cst_46 = arith.constant dense<0.000000e+00> : vector<8x384xf32>
      %100 = tpu.matmul %96, %99, %cst_46 {dimension_numbers = #tpu.dot_dimension_numbers<[1], [0], [0], [1], [0, 0, 1, 1], [], []>} : vector<8x128xbf16>, vector<128x384xbf16>, vector<8x384xf32> -> vector<8x384xf32>
      %101 = arith.index_cast %c2_i32 : i32 to index
      %c0_47 = arith.constant 0 : index
      %c0_48 = arith.constant 0 : index
      %102 = vector.load %arg12[%101, %c0_47, %c0_48] : memref<10x1x384xf32, #tpu.memory_space<vmem>>, vector<1x1x384xf32>
      %103 = vector.shape_cast %102 : vector<1x1x384xf32> to vector<1x384xf32>
      %104 = vector.broadcast %103 : vector<1x384xf32> to vector<8x384xf32>
      %105 = arith.addf %100, %104 : vector<8x384xf32>
      %106 = vector.extract_strided_slice %105 {offsets = [0, 0], sizes = [8, 128], strides = [1, 1]} : vector<8x384xf32> to vector<8x128xf32>
      %107 = arith.negf %106 : vector<8x128xf32>
      %108 = math.exp %107 : vector<8x128xf32>
      %cst_49 = arith.constant 1.000000e+00 : f32
      %109 = vector.broadcast %cst_49 : f32 to vector<8x128xf32>
      %110 = arith.addf %109, %108 : vector<8x128xf32>
      %111 = arith.divf %109, %110 : vector<8x128xf32>
      %112 = vector.extract_strided_slice %105 {offsets = [0, 128], sizes = [8, 128], strides = [1, 1]} : vector<8x384xf32> to vector<8x128xf32>
      %cst_50 = arith.constant 0.000000e+00 : f32
      %113 = vector.broadcast %cst_50 : f32 to vector<8x128xf32>
      %114 = arith.maximumf %112, %113 : vector<8x128xf32>
      %115 = vector.extract_strided_slice %105 {offsets = [0, 256], sizes = [8, 128], strides = [1, 1]} : vector<8x384xf32> to vector<8x128xf32>
      %116 = arith.mulf %111, %114 : vector<8x128xf32>
      %cst_51 = arith.constant 1.000000e+00 : f32
      %117 = vector.broadcast %cst_51 : f32 to vector<8x128xf32>
      %118 = arith.subf %117, %111 : vector<8x128xf32>
      %119 = arith.mulf %118, %115 : vector<8x128xf32>
      %120 = arith.addf %116, %119 : vector<8x128xf32>
      %c3_i32 = arith.constant 3 : i32
      %121 = arith.truncf %120 : vector<8x128xf32> to vector<8x128xbf16>
      %122 = arith.index_cast %c3_i32 : i32 to index
      %c0_52 = arith.constant 0 : index
      %c0_53 = arith.constant 0 : index
      %123 = vector.load %arg11[%122, %c0_52, %c0_53] : memref<10x128x384xbf16, #tpu.memory_space<vmem>>, vector<1x128x384xbf16>
      %124 = vector.shape_cast %123 : vector<1x128x384xbf16> to vector<128x384xbf16>
      %cst_54 = arith.constant dense<0.000000e+00> : vector<8x384xf32>
      %125 = tpu.matmul %121, %124, %cst_54 {dimension_numbers = #tpu.dot_dimension_numbers<[1], [0], [0], [1], [0, 0, 1, 1], [], []>} : vector<8x128xbf16>, vector<128x384xbf16>, vector<8x384xf32> -> vector<8x384xf32>
      %126 = arith.index_cast %c3_i32 : i32 to index
      %c0_55 = arith.constant 0 : index
      %c0_56 = arith.constant 0 : index
      %127 = vector.load %arg12[%126, %c0_55, %c0_56] : memref<10x1x384xf32, #tpu.memory_space<vmem>>, vector<1x1x384xf32>
      %128 = vector.shape_cast %127 : vector<1x1x384xf32> to vector<1x384xf32>
      %129 = vector.broadcast %128 : vector<1x384xf32> to vector<8x384xf32>
      %130 = arith.addf %125, %129 : vector<8x384xf32>
      %131 = vector.extract_strided_slice %130 {offsets = [0, 0], sizes = [8, 128], strides = [1, 1]} : vector<8x384xf32> to vector<8x128xf32>
      %132 = arith.negf %131 : vector<8x128xf32>
      %133 = math.exp %132 : vector<8x128xf32>
      %cst_57 = arith.constant 1.000000e+00 : f32
      %134 = vector.broadcast %cst_57 : f32 to vector<8x128xf32>
      %135 = arith.addf %134, %133 : vector<8x128xf32>
      %136 = arith.divf %134, %135 : vector<8x128xf32>
      %137 = vector.extract_strided_slice %130 {offsets = [0, 128], sizes = [8, 128], strides = [1, 1]} : vector<8x384xf32> to vector<8x128xf32>
      %cst_58 = arith.constant 0.000000e+00 : f32
      %138 = vector.broadcast %cst_58 : f32 to vector<8x128xf32>
      %139 = arith.maximumf %137, %138 : vector<8x128xf32>
      %140 = vector.extract_strided_slice %130 {offsets = [0, 256], sizes = [8, 128], strides = [1, 1]} : vector<8x384xf32> to vector<8x128xf32>
      %141 = arith.mulf %136, %139 : vector<8x128xf32>
      %cst_59 = arith.constant 1.000000e+00 : f32
      %142 = vector.broadcast %cst_59 : f32 to vector<8x128xf32>
      %143 = arith.subf %142, %136 : vector<8x128xf32>
      %144 = arith.mulf %143, %140 : vector<8x128xf32>
      %145 = arith.addf %141, %144 : vector<8x128xf32>
      %c4_i32 = arith.constant 4 : i32
      %146 = arith.truncf %145 : vector<8x128xf32> to vector<8x128xbf16>
      %147 = arith.index_cast %c4_i32 : i32 to index
      %c0_60 = arith.constant 0 : index
      %c0_61 = arith.constant 0 : index
      %148 = vector.load %arg11[%147, %c0_60, %c0_61] : memref<10x128x384xbf16, #tpu.memory_space<vmem>>, vector<1x128x384xbf16>
      %149 = vector.shape_cast %148 : vector<1x128x384xbf16> to vector<128x384xbf16>
      %cst_62 = arith.constant dense<0.000000e+00> : vector<8x384xf32>
      %150 = tpu.matmul %146, %149, %cst_62 {dimension_numbers = #tpu.dot_dimension_numbers<[1], [0], [0], [1], [0, 0, 1, 1], [], []>} : vector<8x128xbf16>, vector<128x384xbf16>, vector<8x384xf32> -> vector<8x384xf32>
      %151 = arith.index_cast %c4_i32 : i32 to index
      %c0_63 = arith.constant 0 : index
      %c0_64 = arith.constant 0 : index
      %152 = vector.load %arg12[%151, %c0_63, %c0_64] : memref<10x1x384xf32, #tpu.memory_space<vmem>>, vector<1x1x384xf32>
      %153 = vector.shape_cast %152 : vector<1x1x384xf32> to vector<1x384xf32>
      %154 = vector.broadcast %153 : vector<1x384xf32> to vector<8x384xf32>
      %155 = arith.addf %150, %154 : vector<8x384xf32>
      %156 = vector.extract_strided_slice %155 {offsets = [0, 0], sizes = [8, 128], strides = [1, 1]} : vector<8x384xf32> to vector<8x128xf32>
      %157 = arith.negf %156 : vector<8x128xf32>
      %158 = math.exp %157 : vector<8x128xf32>
      %cst_65 = arith.constant 1.000000e+00 : f32
      %159 = vector.broadcast %cst_65 : f32 to vector<8x128xf32>
      %160 = arith.addf %159, %158 : vector<8x128xf32>
      %161 = arith.divf %159, %160 : vector<8x128xf32>
      %162 = vector.extract_strided_slice %155 {offsets = [0, 128], sizes = [8, 128], strides = [1, 1]} : vector<8x384xf32> to vector<8x128xf32>
      %cst_66 = arith.constant 0.000000e+00 : f32
      %163 = vector.broadcast %cst_66 : f32 to vector<8x128xf32>
      %164 = arith.maximumf %162, %163 : vector<8x128xf32>
      %165 = vector.extract_strided_slice %155 {offsets = [0, 256], sizes = [8, 128], strides = [1, 1]} : vector<8x384xf32> to vector<8x128xf32>
      %166 = arith.mulf %161, %164 : vector<8x128xf32>
      %cst_67 = arith.constant 1.000000e+00 : f32
      %167 = vector.broadcast %cst_67 : f32 to vector<8x128xf32>
      %168 = arith.subf %167, %161 : vector<8x128xf32>
      %169 = arith.mulf %168, %165 : vector<8x128xf32>
      %170 = arith.addf %166, %169 : vector<8x128xf32>
      %c5_i32 = arith.constant 5 : i32
      %171 = arith.truncf %170 : vector<8x128xf32> to vector<8x128xbf16>
      %172 = arith.index_cast %c5_i32 : i32 to index
      %c0_68 = arith.constant 0 : index
      %c0_69 = arith.constant 0 : index
      %173 = vector.load %arg11[%172, %c0_68, %c0_69] : memref<10x128x384xbf16, #tpu.memory_space<vmem>>, vector<1x128x384xbf16>
      %174 = vector.shape_cast %173 : vector<1x128x384xbf16> to vector<128x384xbf16>
      %cst_70 = arith.constant dense<0.000000e+00> : vector<8x384xf32>
      %175 = tpu.matmul %171, %174, %cst_70 {dimension_numbers = #tpu.dot_dimension_numbers<[1], [0], [0], [1], [0, 0, 1, 1], [], []>} : vector<8x128xbf16>, vector<128x384xbf16>, vector<8x384xf32> -> vector<8x384xf32>
      %176 = arith.index_cast %c5_i32 : i32 to index
      %c0_71 = arith.constant 0 : index
      %c0_72 = arith.constant 0 : index
      %177 = vector.load %arg12[%176, %c0_71, %c0_72] : memref<10x1x384xf32, #tpu.memory_space<vmem>>, vector<1x1x384xf32>
      %178 = vector.shape_cast %177 : vector<1x1x384xf32> to vector<1x384xf32>
      %179 = vector.broadcast %178 : vector<1x384xf32> to vector<8x384xf32>
      %180 = arith.addf %175, %179 : vector<8x384xf32>
      %181 = vector.extract_strided_slice %180 {offsets = [0, 0], sizes = [8, 128], strides = [1, 1]} : vector<8x384xf32> to vector<8x128xf32>
      %182 = arith.negf %181 : vector<8x128xf32>
      %183 = math.exp %182 : vector<8x128xf32>
      %cst_73 = arith.constant 1.000000e+00 : f32
      %184 = vector.broadcast %cst_73 : f32 to vector<8x128xf32>
      %185 = arith.addf %184, %183 : vector<8x128xf32>
      %186 = arith.divf %184, %185 : vector<8x128xf32>
      %187 = vector.extract_strided_slice %180 {offsets = [0, 128], sizes = [8, 128], strides = [1, 1]} : vector<8x384xf32> to vector<8x128xf32>
      %cst_74 = arith.constant 0.000000e+00 : f32
      %188 = vector.broadcast %cst_74 : f32 to vector<8x128xf32>
      %189 = arith.maximumf %187, %188 : vector<8x128xf32>
      %190 = vector.extract_strided_slice %180 {offsets = [0, 256], sizes = [8, 128], strides = [1, 1]} : vector<8x384xf32> to vector<8x128xf32>
      %191 = arith.mulf %186, %189 : vector<8x128xf32>
      %cst_75 = arith.constant 1.000000e+00 : f32
      %192 = vector.broadcast %cst_75 : f32 to vector<8x128xf32>
      %193 = arith.subf %192, %186 : vector<8x128xf32>
      %194 = arith.mulf %193, %190 : vector<8x128xf32>
      %195 = arith.addf %191, %194 : vector<8x128xf32>
      %c6_i32 = arith.constant 6 : i32
      %196 = arith.truncf %195 : vector<8x128xf32> to vector<8x128xbf16>
      %197 = arith.index_cast %c6_i32 : i32 to index
      %c0_76 = arith.constant 0 : index
      %c0_77 = arith.constant 0 : index
      %198 = vector.load %arg11[%197, %c0_76, %c0_77] : memref<10x128x384xbf16, #tpu.memory_space<vmem>>, vector<1x128x384xbf16>
      %199 = vector.shape_cast %198 : vector<1x128x384xbf16> to vector<128x384xbf16>
      %cst_78 = arith.constant dense<0.000000e+00> : vector<8x384xf32>
      %200 = tpu.matmul %196, %199, %cst_78 {dimension_numbers = #tpu.dot_dimension_numbers<[1], [0], [0], [1], [0, 0, 1, 1], [], []>} : vector<8x128xbf16>, vector<128x384xbf16>, vector<8x384xf32> -> vector<8x384xf32>
      %201 = arith.index_cast %c6_i32 : i32 to index
      %c0_79 = arith.constant 0 : index
      %c0_80 = arith.constant 0 : index
      %202 = vector.load %arg12[%201, %c0_79, %c0_80] : memref<10x1x384xf32, #tpu.memory_space<vmem>>, vector<1x1x384xf32>
      %203 = vector.shape_cast %202 : vector<1x1x384xf32> to vector<1x384xf32>
      %204 = vector.broadcast %203 : vector<1x384xf32> to vector<8x384xf32>
      %205 = arith.addf %200, %204 : vector<8x384xf32>
      %206 = vector.extract_strided_slice %205 {offsets = [0, 0], sizes = [8, 128], strides = [1, 1]} : vector<8x384xf32> to vector<8x128xf32>
      %207 = arith.negf %206 : vector<8x128xf32>
      %208 = math.exp %207 : vector<8x128xf32>
      %cst_81 = arith.constant 1.000000e+00 : f32
      %209 = vector.broadcast %cst_81 : f32 to vector<8x128xf32>
      %210 = arith.addf %209, %208 : vector<8x128xf32>
      %211 = arith.divf %209, %210 : vector<8x128xf32>
      %212 = vector.extract_strided_slice %205 {offsets = [0, 128], sizes = [8, 128], strides = [1, 1]} : vector<8x384xf32> to vector<8x128xf32>
      %cst_82 = arith.constant 0.000000e+00 : f32
      %213 = vector.broadcast %cst_82 : f32 to vector<8x128xf32>
      %214 = arith.maximumf %212, %213 : vector<8x128xf32>
      %215 = vector.extract_strided_slice %205 {offsets = [0, 256], sizes = [8, 128], strides = [1, 1]} : vector<8x384xf32> to vector<8x128xf32>
      %216 = arith.mulf %211, %214 : vector<8x128xf32>
      %cst_83 = arith.constant 1.000000e+00 : f32
      %217 = vector.broadcast %cst_83 : f32 to vector<8x128xf32>
      %218 = arith.subf %217, %211 : vector<8x128xf32>
      %219 = arith.mulf %218, %215 : vector<8x128xf32>
      %220 = arith.addf %216, %219 : vector<8x128xf32>
      %c7_i32 = arith.constant 7 : i32
      %221 = arith.truncf %220 : vector<8x128xf32> to vector<8x128xbf16>
      %222 = arith.index_cast %c7_i32 : i32 to index
      %c0_84 = arith.constant 0 : index
      %c0_85 = arith.constant 0 : index
      %223 = vector.load %arg11[%222, %c0_84, %c0_85] : memref<10x128x384xbf16, #tpu.memory_space<vmem>>, vector<1x128x384xbf16>
      %224 = vector.shape_cast %223 : vector<1x128x384xbf16> to vector<128x384xbf16>
      %cst_86 = arith.constant dense<0.000000e+00> : vector<8x384xf32>
      %225 = tpu.matmul %221, %224, %cst_86 {dimension_numbers = #tpu.dot_dimension_numbers<[1], [0], [0], [1], [0, 0, 1, 1], [], []>} : vector<8x128xbf16>, vector<128x384xbf16>, vector<8x384xf32> -> vector<8x384xf32>
      %226 = arith.index_cast %c7_i32 : i32 to index
      %c0_87 = arith.constant 0 : index
      %c0_88 = arith.constant 0 : index
      %227 = vector.load %arg12[%226, %c0_87, %c0_88] : memref<10x1x384xf32, #tpu.memory_space<vmem>>, vector<1x1x384xf32>
      %228 = vector.shape_cast %227 : vector<1x1x384xf32> to vector<1x384xf32>
      %229 = vector.broadcast %228 : vector<1x384xf32> to vector<8x384xf32>
      %230 = arith.addf %225, %229 : vector<8x384xf32>
      %231 = vector.extract_strided_slice %230 {offsets = [0, 0], sizes = [8, 128], strides = [1, 1]} : vector<8x384xf32> to vector<8x128xf32>
      %232 = arith.negf %231 : vector<8x128xf32>
      %233 = math.exp %232 : vector<8x128xf32>
      %cst_89 = arith.constant 1.000000e+00 : f32
      %234 = vector.broadcast %cst_89 : f32 to vector<8x128xf32>
      %235 = arith.addf %234, %233 : vector<8x128xf32>
      %236 = arith.divf %234, %235 : vector<8x128xf32>
      %237 = vector.extract_strided_slice %230 {offsets = [0, 128], sizes = [8, 128], strides = [1, 1]} : vector<8x384xf32> to vector<8x128xf32>
      %cst_90 = arith.constant 0.000000e+00 : f32
      %238 = vector.broadcast %cst_90 : f32 to vector<8x128xf32>
      %239 = arith.maximumf %237, %238 : vector<8x128xf32>
      %240 = vector.extract_strided_slice %230 {offsets = [0, 256], sizes = [8, 128], strides = [1, 1]} : vector<8x384xf32> to vector<8x128xf32>
      %241 = arith.mulf %236, %239 : vector<8x128xf32>
      %cst_91 = arith.constant 1.000000e+00 : f32
      %242 = vector.broadcast %cst_91 : f32 to vector<8x128xf32>
      %243 = arith.subf %242, %236 : vector<8x128xf32>
      %244 = arith.mulf %243, %240 : vector<8x128xf32>
      %245 = arith.addf %241, %244 : vector<8x128xf32>
      %c8_i32 = arith.constant 8 : i32
      %246 = arith.truncf %245 : vector<8x128xf32> to vector<8x128xbf16>
      %247 = arith.index_cast %c8_i32 : i32 to index
      %c0_92 = arith.constant 0 : index
      %c0_93 = arith.constant 0 : index
      %248 = vector.load %arg11[%247, %c0_92, %c0_93] : memref<10x128x384xbf16, #tpu.memory_space<vmem>>, vector<1x128x384xbf16>
      %249 = vector.shape_cast %248 : vector<1x128x384xbf16> to vector<128x384xbf16>
      %cst_94 = arith.constant dense<0.000000e+00> : vector<8x384xf32>
      %250 = tpu.matmul %246, %249, %cst_94 {dimension_numbers = #tpu.dot_dimension_numbers<[1], [0], [0], [1], [0, 0, 1, 1], [], []>} : vector<8x128xbf16>, vector<128x384xbf16>, vector<8x384xf32> -> vector<8x384xf32>
      %251 = arith.index_cast %c8_i32 : i32 to index
      %c0_95 = arith.constant 0 : index
      %c0_96 = arith.constant 0 : index
      %252 = vector.load %arg12[%251, %c0_95, %c0_96] : memref<10x1x384xf32, #tpu.memory_space<vmem>>, vector<1x1x384xf32>
      %253 = vector.shape_cast %252 : vector<1x1x384xf32> to vector<1x384xf32>
      %254 = vector.broadcast %253 : vector<1x384xf32> to vector<8x384xf32>
      %255 = arith.addf %250, %254 : vector<8x384xf32>
      %256 = vector.extract_strided_slice %255 {offsets = [0, 0], sizes = [8, 128], strides = [1, 1]} : vector<8x384xf32> to vector<8x128xf32>
      %257 = arith.negf %256 : vector<8x128xf32>
      %258 = math.exp %257 : vector<8x128xf32>
      %cst_97 = arith.constant 1.000000e+00 : f32
      %259 = vector.broadcast %cst_97 : f32 to vector<8x128xf32>
      %260 = arith.addf %259, %258 : vector<8x128xf32>
      %261 = arith.divf %259, %260 : vector<8x128xf32>
      %262 = vector.extract_strided_slice %255 {offsets = [0, 128], sizes = [8, 128], strides = [1, 1]} : vector<8x384xf32> to vector<8x128xf32>
      %cst_98 = arith.constant 0.000000e+00 : f32
      %263 = vector.broadcast %cst_98 : f32 to vector<8x128xf32>
      %264 = arith.maximumf %262, %263 : vector<8x128xf32>
      %265 = vector.extract_strided_slice %255 {offsets = [0, 256], sizes = [8, 128], strides = [1, 1]} : vector<8x384xf32> to vector<8x128xf32>
      %266 = arith.mulf %261, %264 : vector<8x128xf32>
      %cst_99 = arith.constant 1.000000e+00 : f32
      %267 = vector.broadcast %cst_99 : f32 to vector<8x128xf32>
      %268 = arith.subf %267, %261 : vector<8x128xf32>
      %269 = arith.mulf %268, %265 : vector<8x128xf32>
      %270 = arith.addf %266, %269 : vector<8x128xf32>
      %c9_i32 = arith.constant 9 : i32
      %271 = arith.truncf %270 : vector<8x128xf32> to vector<8x128xbf16>
      %272 = arith.index_cast %c9_i32 : i32 to index
      %c0_100 = arith.constant 0 : index
      %c0_101 = arith.constant 0 : index
      %273 = vector.load %arg11[%272, %c0_100, %c0_101] : memref<10x128x384xbf16, #tpu.memory_space<vmem>>, vector<1x128x384xbf16>
      %274 = vector.shape_cast %273 : vector<1x128x384xbf16> to vector<128x384xbf16>
      %cst_102 = arith.constant dense<0.000000e+00> : vector<8x384xf32>
      %275 = tpu.matmul %271, %274, %cst_102 {dimension_numbers = #tpu.dot_dimension_numbers<[1], [0], [0], [1], [0, 0, 1, 1], [], []>} : vector<8x128xbf16>, vector<128x384xbf16>, vector<8x384xf32> -> vector<8x384xf32>
      %276 = arith.index_cast %c9_i32 : i32 to index
      %c0_103 = arith.constant 0 : index
      %c0_104 = arith.constant 0 : index
      %277 = vector.load %arg12[%276, %c0_103, %c0_104] : memref<10x1x384xf32, #tpu.memory_space<vmem>>, vector<1x1x384xf32>
      %278 = vector.shape_cast %277 : vector<1x1x384xf32> to vector<1x384xf32>
      %279 = vector.broadcast %278 : vector<1x384xf32> to vector<8x384xf32>
      %280 = arith.addf %275, %279 : vector<8x384xf32>
      %281 = vector.extract_strided_slice %280 {offsets = [0, 0], sizes = [8, 128], strides = [1, 1]} : vector<8x384xf32> to vector<8x128xf32>
      %282 = arith.negf %281 : vector<8x128xf32>
      %283 = math.exp %282 : vector<8x128xf32>
      %cst_105 = arith.constant 1.000000e+00 : f32
      %284 = vector.broadcast %cst_105 : f32 to vector<8x128xf32>
      %285 = arith.addf %284, %283 : vector<8x128xf32>
      %286 = arith.divf %284, %285 : vector<8x128xf32>
      %287 = vector.extract_strided_slice %280 {offsets = [0, 128], sizes = [8, 128], strides = [1, 1]} : vector<8x384xf32> to vector<8x128xf32>
      %cst_106 = arith.constant 0.000000e+00 : f32
      %288 = vector.broadcast %cst_106 : f32 to vector<8x128xf32>
      %289 = arith.maximumf %287, %288 : vector<8x128xf32>
      %290 = vector.extract_strided_slice %280 {offsets = [0, 256], sizes = [8, 128], strides = [1, 1]} : vector<8x384xf32> to vector<8x128xf32>
      %291 = arith.mulf %286, %289 : vector<8x128xf32>
      %cst_107 = arith.constant 1.000000e+00 : f32
      %292 = vector.broadcast %cst_107 : f32 to vector<8x128xf32>
      %293 = arith.subf %292, %286 : vector<8x128xf32>
      %294 = arith.mulf %293, %290 : vector<8x128xf32>
      %295 = arith.addf %291, %294 : vector<8x128xf32>
      %c10_i32 = arith.constant 10 : i32
      %296 = arith.negf %295 : vector<8x128xf32>
      %297 = math.exp %296 : vector<8x128xf32>
      %cst_108 = arith.constant 1.000000e+00 : f32
      %298 = vector.broadcast %cst_108 : f32 to vector<8x128xf32>
      %299 = arith.addf %298, %297 : vector<8x128xf32>
      %300 = arith.divf %298, %299 : vector<8x128xf32>
      %c0_109 = arith.constant 0 : index
      %c0_110 = arith.constant 0 : index
      %301 = vector.load %arg9[%c0_109, %c0_110] : memref<8x128xf32, #tpu.memory_space<vmem>>, vector<8x128xf32>
      tpu.vector_store %arg9[%c0_109, %c0_110], %300 {strides = array<i32>} : memref<8x128xf32, #tpu.memory_space<vmem>>, vector<8x128xf32>,
    } else {
    }
    return
  }
  func.func @transform_0(%arg0: i32) -> (i32, i32) {
    %c0_i32 = arith.constant 0 : i32
    %c0_i32_0 = arith.constant 0 : i32
    %c0_i32_1 = arith.constant 0 : i32
    return %c0_i32, %c0_i32_0 : i32, i32
  }
  func.func @transform_1(%arg0: i32) -> (i32, i32) {
    %c0_i32 = arith.constant 0 : i32
    %c0_i32_0 = arith.constant 0 : i32
    return %c0_i32, %arg0 : i32, i32
  }
  func.func @transform_2(%arg0: i32) -> (i32, i32) {
    %c0_i32 = arith.constant 0 : i32
    %c0_i32_0 = arith.constant 0 : i32
    return %arg0, %c0_i32 : i32, i32
  }
  func.func @transform_3(%arg0: i32) -> (i32, i32) {
    %c0_i32 = arith.constant 0 : i32
    %c0_i32_0 = arith.constant 0 : i32
    %c0_i32_1 = arith.constant 0 : i32
    return %c0_i32, %c0_i32_0 : i32, i32
  }
  func.func @transform_4(%arg0: i32) -> (i32, i32) {
    %c0_i32 = arith.constant 0 : i32
    %c0_i32_0 = arith.constant 0 : i32
    %c0_i32_1 = arith.constant 0 : i32
    return %c0_i32, %c0_i32_0 : i32, i32
  }
  func.func @transform_5(%arg0: i32) -> (i32, i32) {
    %c0_i32 = arith.constant 0 : i32
    %c0_i32_0 = arith.constant 0 : i32
    %c0_i32_1 = arith.constant 0 : i32
    return %c0_i32, %c0_i32_0 : i32, i32
  }
  func.func @transform_8(%arg0: i32) -> (i32, i32) {
    %c0_i32 = arith.constant 0 : i32
    %c0_i32_0 = arith.constant 0 : i32
    %c0_i32_1 = arith.constant 0 : i32
    return %c0_i32, %c0_i32_0 : i32, i32
  }
}

</mosaic_0001>

<bundles_post_ra>
// kernel: tpu_custom_call.1
= control target key start
LH: loop header
LB: loop body
LE: loop exit
PB: predicated region body
PF: predicated region fallthrough
CT: control target
= control target key end

     0   :  { %13 = vsyncpa [#allocation7], 0  ;;  %s2521_s0 = inlined_call_operand.vmem [shape: f32[8,1], index: 0, kind: input, shape index: {}]   ;;  %s2522_s1 = inlined_call_operand.hbm [shape: f32[8,128], index: 1, kind: input, shape index: {}]   ;;  %s2523_s2 = inlined_call_operand.hbm [shape: bf16[128,128], index: 2, kind: input, shape index: {}]   ;;  %s2524_s3 = inlined_call_operand.vmem [shape: f32[1,128], index: 3, kind: input, shape index: {}]   ;;  %s2525_s4 = inlined_call_operand.vmem [shape: f32[1,128], index: 4, kind: input, shape index: {}]   ;;  %s2526_s5 = inlined_call_operand.vmem [shape: f32[1,128], index: 5, kind: input, shape index: {}]   ;;  %s2527_s6 = inlined_call_operand.hbm [shape: bf16[10,128,384], index: 6, kind: input, shape index: {}]   ;;  %s2528_s7 = inlined_call_operand.vmem [shape: f32[10,1,384], index: 7, kind: input, shape index: {}]   ;;  %s2529_s8 = inlined_call_operand.hbm [shape: f32[8,128], index: 8, kind: output, shape index: {}]  }
   0x1   :  { %14 = vsyncpa [#allocation10], 0 }
   0x2   :  { %15 = vsyncpa [#allocation8], 0  ;;  %s2228_s27 = smov [#allocation6]   ;;  %s2229_s29 = smov [#allocation9]  }
   0x3   :  { %s24_s28 = sshll.u32 %s2228_s27, 4  ;;  %s33_s30 = sshll.u32 %s2229_s29, 4  ;;  %s25_s28 = int_to_ptr.vmem [resolvable:$true] %s24_s28  ;;  %s2291_s30 = int_to_ptr.vmem [resolvable:$true] %s33_s30 }
   0x4   :  { %s2152_s11 = scalar_lea.hbm %s2522_s1, 128 }
   0x5   :  { %p2153_p0 = scmp.ne.s32.totalorder %s2522_s1, %s2152_s11  ;;  %p2156_p1 = scmp.lt.u32.totalorder %s2152_s11, %s2522_s1 }
   0x7   :  { %p2158_p2 = pnand %p2156_p1, %p2153_p0 }
   0x9   :  { %2161 = shalt.err (!%p2158_p2)
}
   0xa   :  { %s2162_s16 = scalar_lea.vmem %s25_s28, 128  ;;  %p2167_p4 = scmp.lt.s32.totalorder %s25_s28, %s25_s28 }
   0xb   :  { %p2163_p3 = scmp.ne.s32.totalorder %s25_s28, %s2162_s16  ;;  %p2168_p5 = scmp.lt.s32.totalorder %s2162_s16, %s2162_s16 }
   0xd   :  { %p2169_p6 = por %p2168_p5, %p2167_p4 }
   0xf   :  { %p2170_p7 = pnand %p2169_p6, %p2163_p3 }
  0x11   :  { %2173 = shalt.err (!%p2170_p7)
}
  0x12   :  { %27 = dma.hbm_to_vmem [thread:$0]  %s2522_s1, 128, %s25_s28, [#allocation7]  }
  0x13   :  { %s2174_s21 = scalar_lea.hbm %s2523_s2, 1024 }
  0x14   :  { %p2175_p8 = scmp.ne.s32.totalorder %s2523_s2, %s2174_s21  ;;  %p2178_p9 = scmp.lt.u32.totalorder %s2174_s21, %s2523_s2 }
  0x16   :  { %p2180_p10 = pnand %p2178_p9, %p2175_p8 }
  0x18   :  { %2183 = shalt.err (!%p2180_p10)
}
  0x19   :  { %s2184_s26 = scalar_lea.vmem %s2291_s30, 1024  ;;  %p2189_p12 = scmp.lt.s32.totalorder %s2291_s30, %s2291_s30 }
  0x1a   :  { %p2185_p11 = scmp.ne.s32.totalorder %s2291_s30, %s2184_s26  ;;  %p2190_p13 = scmp.lt.s32.totalorder %s2184_s26, %s2184_s26 }
  0x1c   :  { %p2191_p0 = por %p2190_p13, %p2189_p12 }
  0x1e   :  { %p2192_p1 = pnand %p2191_p0, %p2185_p11 }
  0x20   :  { %2195 = shalt.err (!%p2192_p1)
}
  0x21   :  { %s2230_s1 = smov 64   ;;  %s2231_s27 = smov 4  }
  0x22   :  { %39 = dma.hbm_to_vmem [thread:$0]  %s2523_s2, 1024, %s2291_s30, [#allocation10], %s2230_s1, %s2230_s1, %s2231_s27  }
  0x23   :  { %2218 = dma.done.wait [#allocation7], 128  }
  0x24   :  { %2219 = vsyncadd [#allocation7], 4294967168 }
  0x25   :  { %2220 = dma.done.wait [#allocation10], 1024  }
  0x26   :  { %2221 = vsyncadd [#allocation10], 4294966272 }
  0x27   :  { %s62_s9 = sld [smem:[#allocation0]]   ;;  %s2232_s10 = smov [#allocation3]  }
  0x28   :  { %s70_s11 = sshll.u32 %s2232_s10, 4  ;;  %s2233_s12 = smov 384   ;;  %s71_s11 = int_to_ptr.vmem [resolvable:$true] %s70_s11 }
  0x29   :  { %74 = sst [smem:[#allocation13]] %s2233_s12  ;;  %s2234_s13 = smov 3  }
  0x2a   :  { %76 = sst [smem:[#allocation13 + $0x1]] %s2233_s12  ;;  %s2235_s14 = smov 64  }
  0x2b   :  { %78 = sst [smem:[#allocation13 + $0x2]] %s2234_s13  ;;  %s2236_s16 = smov 128  }
  0x2c   :  { %80 = sst [smem:[#allocation13 + $0x3]] %s2235_s14  ;;  %s2237_s2 = smov 2  }
  0x2d   :  { %s1733_s15 = sshll.u32 %s62_s9, 26  ;;  %82 = sst [smem:[#allocation13 + $0x4]] %s2236_s16 }
  0x2e   :  { %s1734_s17 = sadd.s32 134217728, %s1733_s15  ;;  %84 = sst [smem:[#allocation13 + $0x5]] %s2237_s2 }
  0x2f   :  { %s2238_s30 = smov 192   ;;  %88 = sst [smem:[#allocation13 + $0x7]] %s2235_s14 }
  0x30   :  { %86 = sst [smem:[#allocation13 + $0x6]] %s2238_s30  ;;  %s2239_s18 = smov 4  }
  0x31   :  { %90 = sst [smem:[#allocation13 + $0x8]] %s2239_s18  ;;  %s2240_s19 = smov [#allocation5]  }
  0x32   :  { %s2241_s20 = smov [#allocation12]  }
  0x33   :  { %92 = dma.general %s2527_s6, 30720, %s71_s11, %s2240_s19, %s2241_s20, [#allocation13], %s1734_s17, 0  }
  0x34   :  { %v131_v0 = vld [vmem:[%s2528_s7] sm:$0xff]  ;;  %v133_v1 = vld [vmem:[%s2528_s7 + $0x8] sm:$0xff]  ;;  %v135_v2 = vld [vmem:[%s2528_s7 + $0x10] sm:$0xff] }
  0x35   :  { %132 = vst [vmem:[#allocation4] sm:$0xff] %v131_v0  ;;  %134 = vst [vmem:[#allocation4 + $0x8] sm:$0xff] %v133_v1  ;;  %v1735_v3 = vld [vmem:[%s2528_s7 + $0x18] sm:$0x3f] }
  0x36   :  { %136 = vst [vmem:[#allocation4 + $0x10] sm:$0xff] %v135_v2  ;;  %147 = vst [vmem:[#allocation4 + $0x18] sm:$0x3f] %v1735_v3 }
  0x37   :  { %151 = vsyncadd [#allocation5 + $0x1], 480  ;;  %v2097_v4 = vld [vmem:[#allocation9] sm:$0xff]   ;;  %v2242_v5 = vmov 0.0   ;;  %v2098_v6 = vld [vmem:[#allocation9 + $0x8] sm:$0xff]   ;;  %vm2243_vm0 = vmmov 0  }
  0x38   :  { %1859 = vmatprep.subr.bf16.mxu0 %v2242_v5  ;;  %1875 = vmatprep.mubr.msk.bf16.mxu0 %vm2243_vm0, %v2242_v5  ;;  %v2099_v7 = vld [vmem:[#allocation9 + $0x10] sm:$0xff]   ;;  %v2100_v8 = vld [vmem:[#allocation9 + $0x18] sm:$0xff]   ;;  %v2101_v9 = vld [vmem:[#allocation9 + $0x20] sm:$0xff]  }
  0x39   :  { %1860 = vmatpush3.bf16.msra.mxu0 %v2097_v4  ;;  %v2102_v10 = vld [vmem:[#allocation9 + $0x28] sm:$0xff]   ;;  %v2103_v11 = vld [vmem:[#allocation9 + $0x30] sm:$0xff]   ;;  %v2104_v12 = vld [vmem:[#allocation9 + $0x38] sm:$0xff]  }
  0x3a   :  { %1861 = vmatprep.subr.bf16.mxu0 %v2242_v5  ;;  %v153_v13 = vld [vmem:[#allocation6] sm:$0xff] }
  0x3b   :  { %v154_v14 = vpack.c.bf16 %v153_v13, %v153_v13 }
  0x3d   :  { %1862 = vmatpush3.bf16.msra.mxu0 %v2098_v6 }
  0x3e   :  { %1863 = vmatprep.subr.bf16.mxu0 %v2242_v5 }
  0x41   :  { %1864 = vmatpush3.bf16.msra.mxu0 %v2099_v7 }
  0x42   :  { %1865 = vmatprep.subr.bf16.mxu0 %v2242_v5 }
  0x45   :  { %1866 = vmatpush3.bf16.msra.mxu0 %v2100_v8 }
  0x46   :  { %1867 = vmatprep.subr.bf16.mxu0 %v2242_v5 }
  0x49   :  { %1868 = vmatpush3.bf16.msra.mxu0 %v2101_v9 }
  0x4a   :  { %1869 = vmatprep.subr.bf16.mxu0 %v2242_v5 }
  0x4d   :  { %1870 = vmatpush3.bf16.msra.mxu0 %v2102_v10 }
  0x4e   :  { %1871 = vmatprep.subr.bf16.mxu0 %v2242_v5 }
  0x51   :  { %1872 = vmatpush3.bf16.msra.mxu0 %v2103_v11 }
  0x52   :  { %1873 = vmatprep.subr.bf16.mxu0 %v2242_v5 }
  0x55   :  { %1874 = vmatpush3.bf16.msra.mxu0 %v2104_v12 }
  0x58   :  { %1876 = vmatmul.mubr.bf16.vlgmr.msra.gmra.mrb[0].mxu0 %v154_v14 }
 0x12b   :  { %v2347_v15 = vpop.f32.mrb[0].mxu0 }
 0x12c   :  { %v1877_v16 = vpop.f32.mrb[1].mxu0 }
 0x12d   :  { %v256_v17 = vpop.f32.mrb[2].mxu0 }
 0x12e   :  { %v1878_v18 = vpop.f32.mrb[3].mxu0 }
 0x12f   :  { %2222 = dma.done.wait [#allocation5], 30720 }
 0x130   :  { %2223 = vsyncadd [#allocation5], 4294936576 }
 0x131   :  { %2224 = dma.done.wait [#allocation5 + $0x1], 480 }
 0x132   :  { %2225 = vsyncadd [#allocation5 + $0x1], 4294966816  ;;  %1879 = vmatprep.subr.bf16.mxu0 %v2242_v5  ;;  %1895 = vmatprep.mubr.msk.bf16.mxu0 %vm2243_vm0, %v2242_v5  ;;  %v2244_v19 = vmov 0   ;;  %v275_v20 = vld [vmem:[%s2521_s0] sm:$0xff]  ;;  %v327_v21 = vld [vmem:[#allocation3 + $0x8] sm:$0xff] }
 0x133   :  { %2105 = vset.pattern.permute.xlu0 %v2244_v19  ;;  %399 = vmatprep.mubr.bf16.mxu1 %v2244_v19  ;;  %v326_v22 = vld [vmem:[#allocation3] sm:$0xff]  ;;  %v328_v23 = vld [vmem:[#allocation3 + $0x10] sm:$0xff]  ;;  %v329_v25 = vld [vmem:[#allocation3 + $0x18] sm:$0xff] }
 0x134   :  { %278 = vperm.xlu0 %2105, %v275_v20   ;;  %367 = vmatprep.subr.bf16.mxu1 %v327_v21  ;;  %v330_v24 = vld [vmem:[#allocation3 + $0x20] sm:$0xff]  ;;  %v331_v26 = vld [vmem:[#allocation3 + $0x28] sm:$0xff]  ;;  %v333_v27 = vld [vmem:[#allocation3 + $0x38] sm:$0xff] }
 0x135   :  { %368 = vmatpush1.bf16.msra.mxu1 %v326_v22  ;;  %1880 = vmatpush3.bf16.msra.mxu0 %v328_v23  ;;  %v332_v28 = vld [vmem:[#allocation3 + $0x30] sm:$0xff]  ;;  %v334_v29 = vld [vmem:[#allocation3 + $0x40] sm:$0xff]  ;;  %v335_v31 = vld [vmem:[#allocation3 + $0x48] sm:$0xff] }
 0x136   :  { %1881 = vmatprep.subr.bf16.mxu0 %v2242_v5  ;;  %369 = vmatprep.subr.bf16.mxu1 %v330_v24  ;;  %v336_v30 = vld [vmem:[#allocation3 + $0x50] sm:$0xff]  ;;  %v337_v32 = vld [vmem:[#allocation3 + $0x58] sm:$0xff]  ;;  %v339_v33 = vld [vmem:[#allocation3 + $0x68] sm:$0xff] }
 0x137   :  { %v338_v34 = vld [vmem:[#allocation3 + $0x60] sm:$0xff]  ;;  %v340_v35 = vld [vmem:[#allocation3 + $0x70] sm:$0xff]  ;;  %v341_v37 = vld [vmem:[#allocation3 + $0x78] sm:$0xff] }
 0x138   :  { %v342_v36 = vld [vmem:[#allocation3 + $0x80] sm:$0xff]  ;;  %v343_v38 = vld [vmem:[#allocation3 + $0x88] sm:$0xff]  ;;  %v345_v39 = vld [vmem:[#allocation3 + $0x98] sm:$0xff] }
 0x139   :  { %370 = vmatpush1.bf16.msra.mxu1 %v329_v25  ;;  %1882 = vmatpush3.bf16.msra.mxu0 %v331_v26  ;;  %v344_v40 = vld [vmem:[#allocation3 + $0x90] sm:$0xff]  ;;  %v346_v41 = vld [vmem:[#allocation3 + $0xa0] sm:$0xff]  ;;  %v347_v43 = vld [vmem:[#allocation3 + $0xa8] sm:$0xff] }
 0x13a   :  { %1883 = vmatprep.subr.bf16.mxu0 %v2242_v5  ;;  %371 = vmatprep.subr.bf16.mxu1 %v333_v27  ;;  %v348_v42 = vld [vmem:[#allocation3 + $0xb0] sm:$0xff]  ;;  %v349_v44 = vld [vmem:[#allocation3 + $0xb8] sm:$0xff]  ;;  %v1744_v45 = vld [vmem:[%s2524_s3] ss:$0 sm:$0xff] }
 0x13b   :  { %v1745_v3 = vld [vmem:[%s2525_s4] ss:$0 sm:$0xff]  ;;  %v462_v10 = vld [vmem:[#allocation3 + $0xc8] sm:$0xff]  ;;  %v463_v12 = vld [vmem:[#allocation3 + $0xd0] sm:$0xff]  ;;  %s2245_s4 = smov [#allocation11]  }
 0x13c   :  { %v1746_v6 = vld [vmem:[%s2526_s5] ss:$0 sm:$0xff]  ;;  %v464_v14 = vld [vmem:[#allocation3 + $0xd8] sm:$0xff]  ;;  %v467_v17 = vld [vmem:[#allocation3 + $0xf0] sm:$0xff]  ;;  %s1696_s5 = sshll.u32 %s2245_s4, 4  ;;  %s1697_s5 = int_to_ptr.vmem [resolvable:$true] %s1696_s5 }
 0x13d   :  { %372 = vmatpush1.bf16.msra.mxu1 %v332_v28  ;;  %1884 = vmatpush3.bf16.msra.mxu0 %v334_v29  ;;  %v461_v11 = vld [vmem:[#allocation3 + $0xc0] sm:$0xff]  ;;  %v468_v16 = vld [vmem:[#allocation3 + $0xf8] sm:$0xff]  ;;  %v471_v20 = vld [vmem:[#allocation3 + $0x110] sm:$0xff]  ;;  %s2196_s13 = scalar_lea.vmem %s1697_s5, 128  ;;  %p2201_p3 = scmp.lt.s32.totalorder %s1697_s5, %s1697_s5 }
 0x13e   :  { %1885 = vmatprep.subr.bf16.mxu0 %v2242_v5  ;;  %373 = vmatprep.subr.bf16.mxu1 %v336_v30  ;;  %v465_v13 = vld [vmem:[#allocation3 + $0xe0] sm:$0xff]  ;;  %v470_v21 = vld [vmem:[#allocation3 + $0x108] sm:$0xff]  ;;  %v472_v22 = vld [vmem:[#allocation3 + $0x118] sm:$0xff]  ;;  %p2197_p2 = scmp.ne.s32.totalorder %s1697_s5, %s2196_s13  ;;  %p2202_p4 = scmp.lt.s32.totalorder %s2196_s13, %s2196_s13 }
 0x13f   :  { %v469_v18 = vld [vmem:[#allocation3 + $0x100] sm:$0xff]  ;;  %v474_v23 = vld [vmem:[#allocation3 + $0x128] sm:$0xff]  ;;  %v475_v25 = vld [vmem:[#allocation3 + $0x130] sm:$0xff] }
 0x140   :  { %v473_v24 = vld [vmem:[#allocation3 + $0x120] sm:$0xff]  ;;  %v476_v27 = vld [vmem:[#allocation3 + $0x138] sm:$0xff]  ;;  %v478_v28 = vld [vmem:[#allocation3 + $0x148] sm:$0xff]  ;;  %p2203_p5 = por %p2202_p4, %p2201_p3 }
 0x141   :  { %374 = vmatpush1.bf16.msra.mxu1 %v335_v31  ;;  %1886 = vmatpush3.bf16.msra.mxu0 %v337_v32  ;;  %v477_v26 = vld [vmem:[#allocation3 + $0x140] sm:$0xff]  ;;  %v480_v29 = vld [vmem:[#allocation3 + $0x158] sm:$0xff]  ;;  %v479_v30 = vld [vmem:[#allocation3 + $0x150] sm:$0xff] }
 0x142   :  { %1887 = vmatprep.subr.bf16.mxu0 %v2242_v5  ;;  %375 = vmatprep.subr.bf16.mxu1 %v339_v33  ;;  %v481_v31 = vld [vmem:[#allocation3 + $0x160] sm:$0xff]  ;;  %v483_v32 = vld [vmem:[#allocation3 + $0x170] sm:$0xff]  ;;  %v482_v33 = vld [vmem:[#allocation3 + $0x168] sm:$0xff]  ;;  %p2204_p6 = pnand %p2203_p5, %p2197_p2 }
 0x145   :  { %376 = vmatpush1.bf16.msra.mxu1 %v338_v34  ;;  %1888 = vmatpush3.bf16.msra.mxu0 %v340_v35  ;;  %v484_v34 = vld [vmem:[#allocation3 + $0x178] sm:$0xff]  ;;  %v352_v35 = vlaneseq }
 0x146   :  { %1889 = vmatprep.subr.bf16.mxu0 %v2242_v5  ;;  %377 = vmatprep.subr.bf16.mxu1 %v342_v36 }
 0x147   :  { %v353_v36 = vshrl.u32 %v352_v35, 7 }
 0x149   :  { %378 = vmatpush1.bf16.msra.mxu1 %v341_v37  ;;  %1890 = vmatpush3.bf16.msra.mxu0 %v343_v38  ;;  %v2386_v37 = vsub.s32 0, %v353_v36  ;;  %v350_v38 = vld [vmem:[#allocation4] sm:$0x7] }
 0x14a   :  { %1891 = vmatprep.subr.bf16.mxu0 %v2242_v5  ;;  %379 = vmatprep.subr.bf16.mxu1 %v345_v39 }
 0x14b   :  { %v355_v39 = vrot.slane %v350_v38, %v2386_v37 }
 0x14d   :  { %380 = vmatpush1.bf16.msra.mxu1 %v344_v40  ;;  %1892 = vmatpush3.bf16.msra.mxu0 %v346_v41 }
 0x14e   :  { %381 = vmatprep.subr.bf16.mxu1 %v348_v42  ;;  %1893 = vmatprep.subr.bf16.mxu0 %v2242_v5 }
 0x151   :  { %382 = vmatpush1.bf16.msra.mxu1 %v347_v43  ;;  %1894 = vmatpush3.bf16.msra.mxu0 %v349_v44 }
 0x152   :  { %1899 = vmatprep.subr.bf16.mxu0 %v2242_v5  ;;  %503 = vmatprep.subr.bf16.mxu1 %v462_v10  ;;  %v605_v10 = vld [vmem:[#allocation3 + $0x1c0] sm:$0xff] }
 0x1b3   :  { %v279_v46 = vpop.permute.xlu0 %278 }
 0x1b4   :  { %v281_v47 = vmul.f32 %v279_v46, %v2347_v15  ;;  %v466_v15 = vld [vmem:[#allocation3 + $0xe8] sm:$0xff] }
 0x1b6   :  { %v289_v48 = vadd.f32 %v1744_v45, %v281_v47 }
 0x1b8   :  { %v290_v49 = vrot.slane %v289_v48, 4 }
 0x1ba   :  { %v291_v50 = vadd.f32 %v290_v49, %v289_v48 }
 0x1bc   :  { %v292_v51 = vrot.slane %v291_v50, 2 }
 0x1be   :  { %v293_v52 = vadd.f32 %v292_v51, %v291_v50  ;;  %v2389_v51 = vsub.s32 1, %v353_v36 }
 0x1c0   :  { %v294_v53 = vrot.slane %v293_v52, 1 }
 0x1c2   :  { %v295_v54 = vadd.f32 %v294_v53, %v293_v52  ;;  %v359_v53 = vrot.slane %v350_v38, %v2389_v51 }
 0x1c4   :  { %v296_v55 = vmul.f32 0.125, %v295_v54  ;;  %v2392_v54 = vsub.s32 2, %v353_v36 }
 0x1c6   :  { %v297_v56 = vsub.f32 %v289_v48, %v296_v55 }
 0x1c8   :  { %v298_v57 = vmul.f32 %v297_v56, %v297_v56 }
 0x1ca   :  { %v299_v58 = vrot.slane %v298_v57, 4 }
 0x1cc   :  { %v300_v59 = vadd.f32 %v299_v58, %v298_v57 }
 0x1ce   :  { %v301_v60 = vrot.slane %v300_v59, 2 }
 0x1d0   :  { %v302_v61 = vadd.f32 %v301_v60, %v300_v59 }
 0x1d2   :  { %v303_v62 = vrot.slane %v302_v61, 1 }
 0x1d4   :  { %v304_v63 = vadd.f32 %v303_v62, %v302_v61 }
 0x1d6   :  { %v305_v0 = vmul.f32 0.125, %v304_v63 }
 0x1d8   :  { %v306_v1 = vadd.f32 1e-05, %v305_v0 }
 0x1da   :  { %2106 = vrsqrt.f32 %v306_v1  ;;  %v598_v1 = vld [vmem:[#allocation3 + $0x188] sm:$0xff] }
 0x1e4   :  { %v2107_v2 = vpop.eup %2106 }
 0x1e5   :  { %v308_v4 = vmul.f32 %v2107_v2, %v297_v56  ;;  %v363_v56 = vrot.slane %v350_v38, %v2392_v54  ;;  %v597_v2 = vld [vmem:[#allocation3 + $0x180] sm:$0xff] }
 0x1e7   :  { %v316_v7 = vmul.f32 %v1745_v3, %v308_v4  ;;  %v599_v3 = vld [vmem:[#allocation3 + $0x190] sm:$0xff]  ;;  %v601_v4 = vld [vmem:[#allocation3 + $0x1a0] sm:$0xff] }
 0x1e9   :  { %v324_v8 = vadd.f32 %v1746_v6, %v316_v7  ;;  %v600_v6 = vld [vmem:[#allocation3 + $0x198] sm:$0xff]  ;;  %v602_v7 = vld [vmem:[#allocation3 + $0x1a8] sm:$0xff] }
 0x1eb   :  { %v325_v9 = vpack.c.bf16 %v324_v8, %v324_v8  ;;  %v604_v8 = vld [vmem:[#allocation3 + $0x1b8] sm:$0xff] }
 0x1ed   :  { %400 = vmatmul.mubr.bf16.vlgmr.msra.gmra.mrb[0].mxu1 %v325_v9  ;;  %1896 = vmatmul.mubr.bf16.vlgmr.msra.gmra.mrb[4].mxu0 %v325_v9  ;;  %v603_v9 = vld [vmem:[#allocation3 + $0x1b0] sm:$0xff] }
 0x1ee   :  { %535 = vmatprep.mubr.bf16.mxu1 %v2244_v19  ;;  %1915 = vmatprep.mubr.msk.bf16.mxu0 %vm2243_vm0, %v2242_v5 }
 0x1ef   :  { %504 = vmatpush1.bf16.msra.mxu1 %v461_v11  ;;  %1900 = vmatpush3.bf16.msra.mxu0 %v463_v12  ;;  %v607_v11 = vld [vmem:[#allocation3 + $0x1d0] sm:$0xff]  ;;  %v606_v12 = vld [vmem:[#allocation3 + $0x1c8] sm:$0xff] }
 0x1f0   :  { %1901 = vmatprep.subr.bf16.mxu0 %v2242_v5  ;;  %505 = vmatprep.subr.bf16.mxu1 %v465_v13  ;;  %v608_v13 = vld [vmem:[#allocation3 + $0x1d8] sm:$0xff] }
 0x1f3   :  { %506 = vmatpush1.bf16.msra.mxu1 %v464_v14  ;;  %1902 = vmatpush3.bf16.msra.mxu0 %v466_v15  ;;  %v610_v14 = vld [vmem:[#allocation3 + $0x1e8] sm:$0xff]  ;;  %v609_v15 = vld [vmem:[#allocation3 + $0x1e0] sm:$0xff] }
 0x1f4   :  { %1903 = vmatprep.subr.bf16.mxu0 %v2242_v5  ;;  %507 = vmatprep.subr.bf16.mxu1 %v468_v16  ;;  %v611_v16 = vld [vmem:[#allocation3 + $0x1f0] sm:$0xff] }
 0x1f7   :  { %508 = vmatpush1.bf16.msra.mxu1 %v467_v17  ;;  %1904 = vmatpush3.bf16.msra.mxu0 %v469_v18  ;;  %v613_v17 = vld [vmem:[#allocation3 + $0x200] sm:$0xff]  ;;  %v612_v18 = vld [vmem:[#allocation3 + $0x1f8] sm:$0xff] }
 0x1f8   :  { %1905 = vmatprep.subr.bf16.mxu0 %v2242_v5  ;;  %509 = vmatprep.subr.bf16.mxu1 %v471_v20  ;;  %v614_v20 = vld [vmem:[#allocation3 + $0x208] sm:$0xff] }
 0x1fb   :  { %510 = vmatpush1.bf16.msra.mxu1 %v470_v21  ;;  %1906 = vmatpush3.bf16.msra.mxu0 %v472_v22  ;;  %v616_v21 = vld [vmem:[#allocation3 + $0x218] sm:$0xff]  ;;  %v615_v22 = vld [vmem:[#allocation3 + $0x210] sm:$0xff] }
 0x1fc   :  { %1907 = vmatprep.subr.bf16.mxu0 %v2242_v5  ;;  %511 = vmatprep.subr.bf16.mxu1 %v474_v23  ;;  %v617_v23 = vld [vmem:[#allocation3 + $0x220] sm:$0xff] }
 0x1ff   :  { %512 = vmatpush1.bf16.msra.mxu1 %v473_v24  ;;  %1908 = vmatpush3.bf16.msra.mxu0 %v475_v25  ;;  %v619_v24 = vld [vmem:[#allocation3 + $0x230] sm:$0xff]  ;;  %v618_v25 = vld [vmem:[#allocation3 + $0x228] sm:$0xff] }
 0x200   :  { %1909 = vmatprep.subr.bf16.mxu0 %v2242_v5  ;;  %513 = vmatprep.subr.bf16.mxu1 %v477_v26  ;;  %v620_v26 = vld [vmem:[#allocation3 + $0x238] sm:$0xff] }
 0x203   :  { %514 = vmatpush1.bf16.msra.mxu1 %v476_v27  ;;  %1910 = vmatpush3.bf16.msra.mxu0 %v478_v28  ;;  %v486_v27 = vld [vmem:[#allocation4 + $0x3] sm:$0x7] }
 0x204   :  { %1911 = vmatprep.subr.bf16.mxu0 %v2242_v5  ;;  %515 = vmatprep.subr.bf16.mxu1 %v480_v29  ;;  %v491_v28 = vrot.slane %v486_v27, %v2386_v37 }
 0x207   :  { %516 = vmatpush1.bf16.msra.mxu1 %v479_v30  ;;  %1912 = vmatpush3.bf16.msra.mxu0 %v481_v31 }
 0x208   :  { %1913 = vmatprep.subr.bf16.mxu0 %v2242_v5  ;;  %517 = vmatprep.subr.bf16.mxu1 %v483_v32 }
 0x20b   :  { %518 = vmatpush1.bf16.msra.mxu1 %v482_v33  ;;  %1914 = vmatpush3.bf16.msra.mxu0 %v484_v34 }
 0x20c   :  { %1919 = vmatprep.subr.bf16.mxu0 %v2242_v5  ;;  %639 = vmatprep.subr.bf16.mxu1 %v598_v1  ;;  %v742_v1 = vld [vmem:[#allocation3 + $0x288] sm:$0xff] }
 0x2c0   :  { %v401_v40 = vpop.f32.mrb[0].mxu1  ;;  %v442_v41 = vpop.f32.mrb[4].mxu0 }
 0x2c1   :  { %v402_v42 = vadd.f32 %v401_v40, %v355_v39  ;;  %v403_v43 = vpop.f32.mrb[1].mxu1  ;;  %v1897_v44 = vpop.f32.mrb[5].mxu0  ;;  %v443_v59 = vadd.f32 %v442_v41, %v363_v56  ;;  %v733_v56 = vld [vmem:[#allocation3 + $0x240] sm:$0xff] }
 0x2c2   :  { %v405_v45 = vpop.f32.mrb[2].mxu1  ;;  %v445_v46 = vpop.f32.mrb[6].mxu0  ;;  %v404_v55 = vadd.f32 %v403_v43, %v359_v53  ;;  %v499_v44 = vrot.slane %v486_v27, %v2392_v54 }
 0x2c3   :  { %v1747_v47 = vmul.f32 -1.442695, %v402_v42  ;;  %v406_v48 = vpop.f32.mrb[3].mxu1  ;;  %v1898_v49 = vpop.f32.mrb[7].mxu0  ;;  %v495_v42 = vrot.slane %v486_v27, %v2389_v51 }
 0x2c4   :  { %v454_v57 = vmax.f32 %v404_v55, 0.0  ;;  %v734_v55 = vld [vmem:[#allocation3 + $0x248] sm:$0xff] }
 0x2c5   :  { %2108 = vpow2.f32 %v1747_v47 }
 0x2cf   :  { %v2109_v50 = vpop.eup %2108 }
 0x2d0   :  { %v451_v52 = vadd.f32 1.0, %v2109_v50 }
 0x2d2   :  { %2110 = vrcp.f32 %v451_v52 }
 0x2dc   :  { %v2111_v58 = vpop.eup %2110 }
 0x2dd   :  { %v456_v60 = vsub.f32 1.0, %v2111_v58  ;;  %v455_v61 = vmul.f32 %v2111_v58, %v454_v57  ;;  %v735_v57 = vld [vmem:[#allocation3 + $0x250] sm:$0xff]  ;;  %v737_v58 = vld [vmem:[#allocation3 + $0x260] sm:$0xff] }
 0x2df   :  { %v457_v62 = vmul.f32 %v456_v60, %v443_v59  ;;  %v736_v59 = vld [vmem:[#allocation3 + $0x258] sm:$0xff]  ;;  %v738_v60 = vld [vmem:[#allocation3 + $0x268] sm:$0xff] }
 0x2e1   :  { %v458_v63 = vadd.f32 %v457_v62, %v455_v61  ;;  %v740_v61 = vld [vmem:[#allocation3 + $0x278] sm:$0xff]  ;;  %v739_v62 = vld [vmem:[#allocation3 + $0x270] sm:$0xff] }
 0x2e3   :  { %v459_v0 = vpack.c.bf16 %v458_v63, %v458_v63  ;;  %v741_v63 = vld [vmem:[#allocation3 + $0x280] sm:$0xff] }
 0x2e5   :  { %536 = vmatmul.mubr.bf16.vlgmr.msra.gmra.mrb[4].mxu1 %v459_v0  ;;  %1916 = vmatmul.mubr.bf16.vlgmr.msra.gmra.mrb[8].mxu0 %v459_v0  ;;  %v743_v0 = vld [vmem:[#allocation3 + $0x290] sm:$0xff] }
 0x2e6   :  { %671 = vmatprep.mubr.bf16.mxu1 %v2244_v19  ;;  %1935 = vmatprep.mubr.msk.bf16.mxu0 %vm2243_vm0, %v2242_v5 }
 0x2e7   :  { %640 = vmatpush1.bf16.msra.mxu1 %v597_v2  ;;  %1920 = vmatpush3.bf16.msra.mxu0 %v599_v3  ;;  %v744_v2 = vld [vmem:[#allocation3 + $0x298] sm:$0xff]  ;;  %v746_v3 = vld [vmem:[#allocation3 + $0x2a8] sm:$0xff] }
 0x2e8   :  { %1921 = vmatprep.subr.bf16.mxu0 %v2242_v5  ;;  %641 = vmatprep.subr.bf16.mxu1 %v601_v4  ;;  %v745_v4 = vld [vmem:[#allocation3 + $0x2a0] sm:$0xff] }
 0x2eb   :  { %642 = vmatpush1.bf16.msra.mxu1 %v600_v6  ;;  %1922 = vmatpush3.bf16.msra.mxu0 %v602_v7  ;;  %v747_v6 = vld [vmem:[#allocation3 + $0x2b0] sm:$0xff]  ;;  %v749_v7 = vld [vmem:[#allocation3 + $0x2c0] sm:$0xff] }
 0x2ec   :  { %1923 = vmatprep.subr.bf16.mxu0 %v2242_v5  ;;  %643 = vmatprep.subr.bf16.mxu1 %v604_v8  ;;  %v748_v8 = vld [vmem:[#allocation3 + $0x2b8] sm:$0xff] }
 0x2ef   :  { %644 = vmatpush1.bf16.msra.mxu1 %v603_v9  ;;  %1924 = vmatpush3.bf16.msra.mxu0 %v605_v10  ;;  %v750_v9 = vld [vmem:[#allocation3 + $0x2c8] sm:$0xff]  ;;  %v752_v10 = vld [vmem:[#allocation3 + $0x2d8] sm:$0xff] }
 0x2f0   :  { %1925 = vmatprep.subr.bf16.mxu0 %v2242_v5  ;;  %645 = vmatprep.subr.bf16.mxu1 %v607_v11  ;;  %v751_v11 = vld [vmem:[#allocation3 + $0x2d0] sm:$0xff] }
 0x2f3   :  { %646 = vmatpush1.bf16.msra.mxu1 %v606_v12  ;;  %1926 = vmatpush3.bf16.msra.mxu0 %v608_v13  ;;  %v753_v12 = vld [vmem:[#allocation3 + $0x2e0] sm:$0xff]  ;;  %v755_v13 = vld [vmem:[#allocation3 + $0x2f0] sm:$0xff] }
 0x2f4   :  { %1927 = vmatprep.subr.bf16.mxu0 %v2242_v5  ;;  %647 = vmatprep.subr.bf16.mxu1 %v610_v14  ;;  %v754_v14 = vld [vmem:[#allocation3 + $0x2e8] sm:$0xff] }
 0x2f7   :  { %648 = vmatpush1.bf16.msra.mxu1 %v609_v15  ;;  %1928 = vmatpush3.bf16.msra.mxu0 %v611_v16  ;;  %v756_v15 = vld [vmem:[#allocation3 + $0x2f8] sm:$0xff]  ;;  %v622_v16 = vld [vmem:[#allocation4 + $0x6] sm:$0x7] }
 0x2f8   :  { %1929 = vmatprep.subr.bf16.mxu0 %v2242_v5  ;;  %649 = vmatprep.subr.bf16.mxu1 %v613_v17  ;;  %v627_v17 = vrot.slane %v622_v16, %v2386_v37 }
 0x2fb   :  { %650 = vmatpush1.bf16.msra.mxu1 %v612_v18  ;;  %1930 = vmatpush3.bf16.msra.mxu0 %v614_v20 }
 0x2fc   :  { %1931 = vmatprep.subr.bf16.mxu0 %v2242_v5  ;;  %651 = vmatprep.subr.bf16.mxu1 %v616_v21 }
 0x2ff   :  { %652 = vmatpush1.bf16.msra.mxu1 %v615_v22  ;;  %1932 = vmatpush3.bf16.msra.mxu0 %v617_v23 }
 0x300   :  { %1933 = vmatprep.subr.bf16.mxu0 %v2242_v5  ;;  %653 = vmatprep.subr.bf16.mxu1 %v619_v24 }
 0x303   :  { %654 = vmatpush1.bf16.msra.mxu1 %v618_v25  ;;  %1934 = vmatpush3.bf16.msra.mxu0 %v620_v26 }
 0x304   :  { %1939 = vmatprep.subr.bf16.mxu0 %v2242_v5  ;;  %775 = vmatprep.subr.bf16.mxu1 %v734_v55  ;;  %v878_v55 = vld [vmem:[#allocation3 + $0x348] sm:$0xff] }
 0x3b8   :  { %v537_v29 = vpop.f32.mrb[4].mxu1  ;;  %v578_v30 = vpop.f32.mrb[8].mxu0 }
 0x3b9   :  { %v538_v31 = vadd.f32 %v537_v29, %v491_v28  ;;  %v539_v32 = vpop.f32.mrb[5].mxu1  ;;  %v1917_v33 = vpop.f32.mrb[9].mxu0  ;;  %v579_v47 = vadd.f32 %v578_v30, %v499_v44  ;;  %v869_v44 = vld [vmem:[#allocation3 + $0x300] sm:$0xff] }
 0x3ba   :  { %v541_v34 = vpop.f32.mrb[6].mxu1  ;;  %v581_v35 = vpop.f32.mrb[10].mxu0  ;;  %v540_v43 = vadd.f32 %v539_v32, %v495_v42  ;;  %v635_v33 = vrot.slane %v622_v16, %v2392_v54 }
 0x3bb   :  { %v1748_v36 = vmul.f32 -1.442695, %v538_v31  ;;  %v542_v38 = vpop.f32.mrb[7].mxu1  ;;  %v1918_v39 = vpop.f32.mrb[11].mxu0  ;;  %v631_v31 = vrot.slane %v622_v16, %v2389_v51 }
 0x3bc   :  { %v590_v45 = vmax.f32 %v540_v43, 0.0  ;;  %v870_v43 = vld [vmem:[#allocation3 + $0x308] sm:$0xff] }
 0x3bd   :  { %2112 = vpow2.f32 %v1748_v36 }
 0x3c7   :  { %v2113_v40 = vpop.eup %2112 }
 0x3c8   :  { %v587_v41 = vadd.f32 1.0, %v2113_v40 }
 0x3ca   :  { %2114 = vrcp.f32 %v587_v41 }
 0x3d4   :  { %v2115_v46 = vpop.eup %2114 }
 0x3d5   :  { %v592_v48 = vsub.f32 1.0, %v2115_v46  ;;  %v591_v49 = vmul.f32 %v2115_v46, %v590_v45  ;;  %v871_v45 = vld [vmem:[#allocation3 + $0x310] sm:$0xff]  ;;  %v873_v46 = vld [vmem:[#allocation3 + $0x320] sm:$0xff] }
 0x3d7   :  { %v593_v50 = vmul.f32 %v592_v48, %v579_v47  ;;  %v872_v47 = vld [vmem:[#allocation3 + $0x318] sm:$0xff]  ;;  %v874_v48 = vld [vmem:[#allocation3 + $0x328] sm:$0xff] }
 0x3d9   :  { %v594_v52 = vadd.f32 %v593_v50, %v591_v49  ;;  %v876_v49 = vld [vmem:[#allocation3 + $0x338] sm:$0xff]  ;;  %v875_v50 = vld [vmem:[#allocation3 + $0x330] sm:$0xff] }
 0x3db   :  { %v595_v53 = vpack.c.bf16 %v594_v52, %v594_v52  ;;  %v877_v52 = vld [vmem:[#allocation3 + $0x340] sm:$0xff] }
 0x3dd   :  { %672 = vmatmul.mubr.bf16.vlgmr.msra.gmra.mrb[8].mxu1 %v595_v53  ;;  %1936 = vmatmul.mubr.bf16.vlgmr.msra.gmra.mrb[12].mxu0 %v595_v53  ;;  %v879_v53 = vld [vmem:[#allocation3 + $0x350] sm:$0xff] }
 0x3de   :  { %807 = vmatprep.mubr.bf16.mxu1 %v2244_v19  ;;  %1955 = vmatprep.mubr.msk.bf16.mxu0 %vm2243_vm0, %v2242_v5 }
 0x3df   :  { %776 = vmatpush1.bf16.msra.mxu1 %v733_v56  ;;  %1940 = vmatpush3.bf16.msra.mxu0 %v735_v57  ;;  %v880_v56 = vld [vmem:[#allocation3 + $0x358] sm:$0xff]  ;;  %v882_v57 = vld [vmem:[#allocation3 + $0x368] sm:$0xff] }
 0x3e0   :  { %1941 = vmatprep.subr.bf16.mxu0 %v2242_v5  ;;  %777 = vmatprep.subr.bf16.mxu1 %v737_v58  ;;  %v881_v58 = vld [vmem:[#allocation3 + $0x360] sm:$0xff] }
 0x3e3   :  { %778 = vmatpush1.bf16.msra.mxu1 %v736_v59  ;;  %1942 = vmatpush3.bf16.msra.mxu0 %v738_v60  ;;  %v883_v59 = vld [vmem:[#allocation3 + $0x370] sm:$0xff]  ;;  %v885_v60 = vld [vmem:[#allocation3 + $0x380] sm:$0xff] }
 0x3e4   :  { %1943 = vmatprep.subr.bf16.mxu0 %v2242_v5  ;;  %779 = vmatprep.subr.bf16.mxu1 %v740_v61  ;;  %v884_v61 = vld [vmem:[#allocation3 + $0x378] sm:$0xff] }
 0x3e7   :  { %780 = vmatpush1.bf16.msra.mxu1 %v739_v62  ;;  %1944 = vmatpush3.bf16.msra.mxu0 %v741_v63  ;;  %v886_v62 = vld [vmem:[#allocation3 + $0x388] sm:$0xff]  ;;  %v888_v63 = vld [vmem:[#allocation3 + $0x398] sm:$0xff] }
 0x3e8   :  { %1945 = vmatprep.subr.bf16.mxu0 %v2242_v5  ;;  %781 = vmatprep.subr.bf16.mxu1 %v743_v0  ;;  %v887_v0 = vld [vmem:[#allocation3 + $0x390] sm:$0xff] }
 0x3eb   :  { %782 = vmatpush1.bf16.msra.mxu1 %v742_v1  ;;  %1946 = vmatpush3.bf16.msra.mxu0 %v744_v2  ;;  %v889_v1 = vld [vmem:[#allocation3 + $0x3a0] sm:$0xff]  ;;  %v891_v2 = vld [vmem:[#allocation3 + $0x3b0] sm:$0xff] }
 0x3ec   :  { %1947 = vmatprep.subr.bf16.mxu0 %v2242_v5  ;;  %783 = vmatprep.subr.bf16.mxu1 %v746_v3  ;;  %v890_v3 = vld [vmem:[#allocation3 + $0x3a8] sm:$0xff] }
 0x3ef   :  { %784 = vmatpush1.bf16.msra.mxu1 %v745_v4  ;;  %1948 = vmatpush3.bf16.msra.mxu0 %v747_v6  ;;  %v892_v4 = vld [vmem:[#allocation3 + $0x3b8] sm:$0xff]  ;;  %v758_v6 = vld [vmem:[#allocation4 + $0x9] sm:$0x7] }
 0x3f0   :  { %1949 = vmatprep.subr.bf16.mxu0 %v2242_v5  ;;  %785 = vmatprep.subr.bf16.mxu1 %v749_v7  ;;  %v763_v7 = vrot.slane %v758_v6, %v2386_v37 }
 0x3f3   :  { %786 = vmatpush1.bf16.msra.mxu1 %v748_v8  ;;  %1950 = vmatpush3.bf16.msra.mxu0 %v750_v9 }
 0x3f4   :  { %1951 = vmatprep.subr.bf16.mxu0 %v2242_v5  ;;  %787 = vmatprep.subr.bf16.mxu1 %v752_v10 }
 0x3f7   :  { %788 = vmatpush1.bf16.msra.mxu1 %v751_v11  ;;  %1952 = vmatpush3.bf16.msra.mxu0 %v753_v12 }
 0x3f8   :  { %1953 = vmatprep.subr.bf16.mxu0 %v2242_v5  ;;  %789 = vmatprep.subr.bf16.mxu1 %v755_v13 }
 0x3fb   :  { %790 = vmatpush1.bf16.msra.mxu1 %v754_v14  ;;  %1954 = vmatpush3.bf16.msra.mxu0 %v756_v15 }
 0x3fc   :  { %1959 = vmatprep.subr.bf16.mxu0 %v2242_v5  ;;  %911 = vmatprep.subr.bf16.mxu1 %v870_v43  ;;  %v1014_v43 = vld [vmem:[#allocation3 + $0x408] sm:$0xff] }
 0x4b0   :  { %v673_v18 = vpop.f32.mrb[8].mxu1  ;;  %v714_v20 = vpop.f32.mrb[12].mxu0 }
 0x4b1   :  { %v674_v21 = vadd.f32 %v673_v18, %v627_v17  ;;  %v675_v22 = vpop.f32.mrb[9].mxu1  ;;  %v1937_v23 = vpop.f32.mrb[13].mxu0  ;;  %v715_v36 = vadd.f32 %v714_v20, %v635_v33  ;;  %v1005_v33 = vld [vmem:[#allocation3 + $0x3c0] sm:$0xff] }
 0x4b2   :  { %v677_v24 = vpop.f32.mrb[10].mxu1  ;;  %v717_v25 = vpop.f32.mrb[14].mxu0  ;;  %v676_v32 = vadd.f32 %v675_v22, %v631_v31  ;;  %v771_v23 = vrot.slane %v758_v6, %v2392_v54 }
 0x4b3   :  { %v1749_v26 = vmul.f32 -1.442695, %v674_v21  ;;  %v678_v27 = vpop.f32.mrb[11].mxu1  ;;  %v1938_v28 = vpop.f32.mrb[15].mxu0  ;;  %v767_v21 = vrot.slane %v758_v6, %v2389_v51 }
 0x4b4   :  { %v726_v34 = vmax.f32 %v676_v32, 0.0  ;;  %v1006_v32 = vld [vmem:[#allocation3 + $0x3c8] sm:$0xff] }
 0x4b5   :  { %2116 = vpow2.f32 %v1749_v26 }
 0x4bf   :  { %v2117_v29 = vpop.eup %2116 }
 0x4c0   :  { %v723_v30 = vadd.f32 1.0, %v2117_v29 }
 0x4c2   :  { %2118 = vrcp.f32 %v723_v30 }
 0x4cc   :  { %v2119_v35 = vpop.eup %2118 }
 0x4cd   :  { %v728_v38 = vsub.f32 1.0, %v2119_v35  ;;  %v727_v39 = vmul.f32 %v2119_v35, %v726_v34  ;;  %v1007_v34 = vld [vmem:[#allocation3 + $0x3d0] sm:$0xff]  ;;  %v1009_v35 = vld [vmem:[#allocation3 + $0x3e0] sm:$0xff] }
 0x4cf   :  { %v729_v40 = vmul.f32 %v728_v38, %v715_v36  ;;  %v1008_v36 = vld [vmem:[#allocation3 + $0x3d8] sm:$0xff]  ;;  %v1010_v38 = vld [vmem:[#allocation3 + $0x3e8] sm:$0xff] }
 0x4d1   :  { %v730_v41 = vadd.f32 %v729_v40, %v727_v39  ;;  %v1012_v39 = vld [vmem:[#allocation3 + $0x3f8] sm:$0xff]  ;;  %v1011_v40 = vld [vmem:[#allocation3 + $0x3f0] sm:$0xff] }
 0x4d3   :  { %v731_v42 = vpack.c.bf16 %v730_v41, %v730_v41  ;;  %v1013_v41 = vld [vmem:[#allocation3 + $0x400] sm:$0xff] }
 0x4d5   :  { %808 = vmatmul.mubr.bf16.vlgmr.msra.gmra.mrb[12].mxu1 %v731_v42  ;;  %1956 = vmatmul.mubr.bf16.vlgmr.msra.gmra.mrb[16].mxu0 %v731_v42  ;;  %v1015_v42 = vld [vmem:[#allocation3 + $0x410] sm:$0xff] }
 0x4d6   :  { %943 = vmatprep.mubr.bf16.mxu1 %v2244_v19  ;;  %1975 = vmatprep.mubr.msk.bf16.mxu0 %vm2243_vm0, %v2242_v5 }
 0x4d7   :  { %912 = vmatpush1.bf16.msra.mxu1 %v869_v44  ;;  %1960 = vmatpush3.bf16.msra.mxu0 %v871_v45  ;;  %v1016_v44 = vld [vmem:[#allocation3 + $0x418] sm:$0xff]  ;;  %v1018_v45 = vld [vmem:[#allocation3 + $0x428] sm:$0xff] }
 0x4d8   :  { %1961 = vmatprep.subr.bf16.mxu0 %v2242_v5  ;;  %913 = vmatprep.subr.bf16.mxu1 %v873_v46  ;;  %v1017_v46 = vld [vmem:[#allocation3 + $0x420] sm:$0xff] }
 0x4db   :  { %914 = vmatpush1.bf16.msra.mxu1 %v872_v47  ;;  %1962 = vmatpush3.bf16.msra.mxu0 %v874_v48  ;;  %v1019_v47 = vld [vmem:[#allocation3 + $0x430] sm:$0xff]  ;;  %v1021_v48 = vld [vmem:[#allocation3 + $0x440] sm:$0xff] }
 0x4dc   :  { %1963 = vmatprep.subr.bf16.mxu0 %v2242_v5  ;;  %915 = vmatprep.subr.bf16.mxu1 %v876_v49  ;;  %v1020_v49 = vld [vmem:[#allocation3 + $0x438] sm:$0xff] }
 0x4df   :  { %916 = vmatpush1.bf16.msra.mxu1 %v875_v50  ;;  %1964 = vmatpush3.bf16.msra.mxu0 %v877_v52  ;;  %v1022_v50 = vld [vmem:[#allocation3 + $0x448] sm:$0xff]  ;;  %v1024_v52 = vld [vmem:[#allocation3 + $0x458] sm:$0xff] }
 0x4e0   :  { %1965 = vmatprep.subr.bf16.mxu0 %v2242_v5  ;;  %917 = vmatprep.subr.bf16.mxu1 %v879_v53  ;;  %v1023_v53 = vld [vmem:[#allocation3 + $0x450] sm:$0xff] }
 0x4e3   :  { %918 = vmatpush1.bf16.msra.mxu1 %v878_v55  ;;  %1966 = vmatpush3.bf16.msra.mxu0 %v880_v56  ;;  %v1025_v55 = vld [vmem:[#allocation3 + $0x460] sm:$0xff]  ;;  %v1027_v56 = vld [vmem:[#allocation3 + $0x470] sm:$0xff] }
 0x4e4   :  { %1967 = vmatprep.subr.bf16.mxu0 %v2242_v5  ;;  %919 = vmatprep.subr.bf16.mxu1 %v882_v57  ;;  %v1026_v57 = vld [vmem:[#allocation3 + $0x468] sm:$0xff] }
 0x4e7   :  { %920 = vmatpush1.bf16.msra.mxu1 %v881_v58  ;;  %1968 = vmatpush3.bf16.msra.mxu0 %v883_v59  ;;  %v1028_v58 = vld [vmem:[#allocation3 + $0x478] sm:$0xff]  ;;  %v894_v59 = vld [vmem:[#allocation4 + $0xc] sm:$0x7] }
 0x4e8   :  { %1969 = vmatprep.subr.bf16.mxu0 %v2242_v5  ;;  %921 = vmatprep.subr.bf16.mxu1 %v885_v60  ;;  %v899_v60 = vrot.slane %v894_v59, %v2386_v37 }
 0x4eb   :  { %922 = vmatpush1.bf16.msra.mxu1 %v884_v61  ;;  %1970 = vmatpush3.bf16.msra.mxu0 %v886_v62 }
 0x4ec   :  { %1971 = vmatprep.subr.bf16.mxu0 %v2242_v5  ;;  %923 = vmatprep.subr.bf16.mxu1 %v888_v63 }
 0x4ef   :  { %924 = vmatpush1.bf16.msra.mxu1 %v887_v0  ;;  %1972 = vmatpush3.bf16.msra.mxu0 %v889_v1 }
 0x4f0   :  { %1973 = vmatprep.subr.bf16.mxu0 %v2242_v5  ;;  %925 = vmatprep.subr.bf16.mxu1 %v891_v2 }
 0x4f3   :  { %926 = vmatpush1.bf16.msra.mxu1 %v890_v3  ;;  %1974 = vmatpush3.bf16.msra.mxu0 %v892_v4 }
 0x4f4   :  { %1979 = vmatprep.subr.bf16.mxu0 %v2242_v5  ;;  %1047 = vmatprep.subr.bf16.mxu1 %v1006_v32  ;;  %v1150_v32 = vld [vmem:[#allocation3 + $0x4c8] sm:$0xff] }
 0x5a8   :  { %v809_v8 = vpop.f32.mrb[12].mxu1  ;;  %v850_v9 = vpop.f32.mrb[16].mxu0 }
 0x5a9   :  { %v810_v10 = vadd.f32 %v809_v8, %v763_v7  ;;  %v811_v11 = vpop.f32.mrb[13].mxu1  ;;  %v1957_v12 = vpop.f32.mrb[17].mxu0  ;;  %v851_v26 = vadd.f32 %v850_v9, %v771_v23  ;;  %v1141_v23 = vld [vmem:[#allocation3 + $0x480] sm:$0xff] }
 0x5aa   :  { %v813_v13 = vpop.f32.mrb[14].mxu1  ;;  %v853_v14 = vpop.f32.mrb[18].mxu0  ;;  %v812_v22 = vadd.f32 %v811_v11, %v767_v21  ;;  %v907_v12 = vrot.slane %v894_v59, %v2392_v54 }
 0x5ab   :  { %v1750_v15 = vmul.f32 -1.442695, %v810_v10  ;;  %v814_v16 = vpop.f32.mrb[15].mxu1  ;;  %v1958_v17 = vpop.f32.mrb[19].mxu0  ;;  %v903_v10 = vrot.slane %v894_v59, %v2389_v51 }
 0x5ac   :  { %v862_v24 = vmax.f32 %v812_v22, 0.0  ;;  %v1142_v22 = vld [vmem:[#allocation3 + $0x488] sm:$0xff] }
 0x5ad   :  { %2120 = vpow2.f32 %v1750_v15 }
 0x5b7   :  { %v2121_v18 = vpop.eup %2120 }
 0x5b8   :  { %v859_v20 = vadd.f32 1.0, %v2121_v18 }
 0x5ba   :  { %2122 = vrcp.f32 %v859_v20 }
 0x5c4   :  { %v2123_v25 = vpop.eup %2122 }
 0x5c5   :  { %v864_v27 = vsub.f32 1.0, %v2123_v25  ;;  %v863_v28 = vmul.f32 %v2123_v25, %v862_v24  ;;  %v1143_v24 = vld [vmem:[#allocation3 + $0x490] sm:$0xff]  ;;  %v1145_v25 = vld [vmem:[#allocation3 + $0x4a0] sm:$0xff] }
 0x5c7   :  { %v865_v29 = vmul.f32 %v864_v27, %v851_v26  ;;  %v1144_v26 = vld [vmem:[#allocation3 + $0x498] sm:$0xff]  ;;  %v1146_v27 = vld [vmem:[#allocation3 + $0x4a8] sm:$0xff] }
 0x5c9   :  { %v866_v30 = vadd.f32 %v865_v29, %v863_v28  ;;  %v1148_v28 = vld [vmem:[#allocation3 + $0x4b8] sm:$0xff]  ;;  %v1147_v29 = vld [vmem:[#allocation3 + $0x4b0] sm:$0xff] }
 0x5cb   :  { %v867_v31 = vpack.c.bf16 %v866_v30, %v866_v30  ;;  %v1149_v30 = vld [vmem:[#allocation3 + $0x4c0] sm:$0xff] }
 0x5cd   :  { %944 = vmatmul.mubr.bf16.vlgmr.msra.gmra.mrb[16].mxu1 %v867_v31  ;;  %1976 = vmatmul.mubr.bf16.vlgmr.msra.gmra.mrb[20].mxu0 %v867_v31  ;;  %v1151_v31 = vld [vmem:[#allocation3 + $0x4d0] sm:$0xff] }
 0x5ce   :  { %1079 = vmatprep.mubr.bf16.mxu1 %v2244_v19  ;;  %1995 = vmatprep.mubr.msk.bf16.mxu0 %vm2243_vm0, %v2242_v5 }
 0x5cf   :  { %1048 = vmatpush1.bf16.msra.mxu1 %v1005_v33  ;;  %1980 = vmatpush3.bf16.msra.mxu0 %v1007_v34  ;;  %v1152_v33 = vld [vmem:[#allocation3 + $0x4d8] sm:$0xff]  ;;  %v1154_v34 = vld [vmem:[#allocation3 + $0x4e8] sm:$0xff] }
 0x5d0   :  { %1981 = vmatprep.subr.bf16.mxu0 %v2242_v5  ;;  %1049 = vmatprep.subr.bf16.mxu1 %v1009_v35  ;;  %v1153_v35 = vld [vmem:[#allocation3 + $0x4e0] sm:$0xff] }
 0x5d3   :  { %1050 = vmatpush1.bf16.msra.mxu1 %v1008_v36  ;;  %1982 = vmatpush3.bf16.msra.mxu0 %v1010_v38  ;;  %v1155_v36 = vld [vmem:[#allocation3 + $0x4f0] sm:$0xff]  ;;  %v1157_v38 = vld [vmem:[#allocation3 + $0x500] sm:$0xff] }
 0x5d4   :  { %1983 = vmatprep.subr.bf16.mxu0 %v2242_v5  ;;  %1051 = vmatprep.subr.bf16.mxu1 %v1012_v39  ;;  %v1156_v39 = vld [vmem:[#allocation3 + $0x4f8] sm:$0xff] }
 0x5d7   :  { %1052 = vmatpush1.bf16.msra.mxu1 %v1011_v40  ;;  %1984 = vmatpush3.bf16.msra.mxu0 %v1013_v41  ;;  %v1158_v40 = vld [vmem:[#allocation3 + $0x508] sm:$0xff]  ;;  %v1160_v41 = vld [vmem:[#allocation3 + $0x518] sm:$0xff] }
 0x5d8   :  { %1985 = vmatprep.subr.bf16.mxu0 %v2242_v5  ;;  %1053 = vmatprep.subr.bf16.mxu1 %v1015_v42  ;;  %v1159_v42 = vld [vmem:[#allocation3 + $0x510] sm:$0xff] }
 0x5db   :  { %1054 = vmatpush1.bf16.msra.mxu1 %v1014_v43  ;;  %1986 = vmatpush3.bf16.msra.mxu0 %v1016_v44  ;;  %v1161_v43 = vld [vmem:[#allocation3 + $0x520] sm:$0xff]  ;;  %v1163_v44 = vld [vmem:[#allocation3 + $0x530] sm:$0xff] }
 0x5dc   :  { %1987 = vmatprep.subr.bf16.mxu0 %v2242_v5  ;;  %1055 = vmatprep.subr.bf16.mxu1 %v1018_v45  ;;  %v1162_v45 = vld [vmem:[#allocation3 + $0x528] sm:$0xff] }
 0x5df   :  { %1056 = vmatpush1.bf16.msra.mxu1 %v1017_v46  ;;  %1988 = vmatpush3.bf16.msra.mxu0 %v1019_v47  ;;  %v1164_v46 = vld [vmem:[#allocation3 + $0x538] sm:$0xff]  ;;  %v1030_v47 = vld [vmem:[#allocation4 + $0xf] sm:$0x7] }
 0x5e0   :  { %1989 = vmatprep.subr.bf16.mxu0 %v2242_v5  ;;  %1057 = vmatprep.subr.bf16.mxu1 %v1021_v48  ;;  %v1035_v48 = vrot.slane %v1030_v47, %v2386_v37 }
 0x5e3   :  { %1058 = vmatpush1.bf16.msra.mxu1 %v1020_v49  ;;  %1990 = vmatpush3.bf16.msra.mxu0 %v1022_v50 }
 0x5e4   :  { %1991 = vmatprep.subr.bf16.mxu0 %v2242_v5  ;;  %1059 = vmatprep.subr.bf16.mxu1 %v1024_v52 }
 0x5e7   :  { %1060 = vmatpush1.bf16.msra.mxu1 %v1023_v53  ;;  %1992 = vmatpush3.bf16.msra.mxu0 %v1025_v55 }
 0x5e8   :  { %1993 = vmatprep.subr.bf16.mxu0 %v2242_v5  ;;  %1061 = vmatprep.subr.bf16.mxu1 %v1027_v56 }
 0x5eb   :  { %1062 = vmatpush1.bf16.msra.mxu1 %v1026_v57  ;;  %1994 = vmatpush3.bf16.msra.mxu0 %v1028_v58 }
 0x5ec   :  { %1999 = vmatprep.subr.bf16.mxu0 %v2242_v5  ;;  %1183 = vmatprep.subr.bf16.mxu1 %v1142_v22  ;;  %v1286_v22 = vld [vmem:[#allocation3 + $0x588] sm:$0xff] }
 0x6a0   :  { %v945_v61 = vpop.f32.mrb[16].mxu1  ;;  %v986_v62 = vpop.f32.mrb[20].mxu0 }
 0x6a1   :  { %v946_v63 = vadd.f32 %v945_v61, %v899_v60  ;;  %v947_v0 = vpop.f32.mrb[17].mxu1  ;;  %v1977_v1 = vpop.f32.mrb[21].mxu0  ;;  %v987_v15 = vadd.f32 %v986_v62, %v907_v12  ;;  %v1277_v12 = vld [vmem:[#allocation3 + $0x540] sm:$0xff] }
 0x6a2   :  { %v949_v2 = vpop.f32.mrb[18].mxu1  ;;  %v989_v3 = vpop.f32.mrb[22].mxu0  ;;  %v948_v11 = vadd.f32 %v947_v0, %v903_v10  ;;  %v1043_v1 = vrot.slane %v1030_v47, %v2392_v54 }
 0x6a3   :  { %v1751_v4 = vmul.f32 -1.442695, %v946_v63  ;;  %v950_v6 = vpop.f32.mrb[19].mxu1  ;;  %v1978_v7 = vpop.f32.mrb[23].mxu0  ;;  %v1039_v63 = vrot.slane %v1030_v47, %v2389_v51 }
 0x6a4   :  { %v998_v13 = vmax.f32 %v948_v11, 0.0  ;;  %v1278_v11 = vld [vmem:[#allocation3 + $0x548] sm:$0xff] }
 0x6a5   :  { %2124 = vpow2.f32 %v1751_v4 }
 0x6af   :  { %v2125_v8 = vpop.eup %2124 }
 0x6b0   :  { %v995_v9 = vadd.f32 1.0, %v2125_v8 }
 0x6b2   :  { %2126 = vrcp.f32 %v995_v9 }
 0x6bc   :  { %v2127_v14 = vpop.eup %2126 }
 0x6bd   :  { %v1000_v16 = vsub.f32 1.0, %v2127_v14  ;;  %v999_v17 = vmul.f32 %v2127_v14, %v998_v13  ;;  %v1279_v13 = vld [vmem:[#allocation3 + $0x550] sm:$0xff]  ;;  %v1281_v14 = vld [vmem:[#allocation3 + $0x560] sm:$0xff] }
 0x6bf   :  { %v1001_v18 = vmul.f32 %v1000_v16, %v987_v15  ;;  %v1280_v15 = vld [vmem:[#allocation3 + $0x558] sm:$0xff]  ;;  %v1282_v16 = vld [vmem:[#allocation3 + $0x568] sm:$0xff] }
 0x6c1   :  { %v1002_v20 = vadd.f32 %v1001_v18, %v999_v17  ;;  %v1284_v17 = vld [vmem:[#allocation3 + $0x578] sm:$0xff]  ;;  %v1283_v18 = vld [vmem:[#allocation3 + $0x570] sm:$0xff] }
 0x6c3   :  { %v1003_v21 = vpack.c.bf16 %v1002_v20, %v1002_v20  ;;  %v1285_v20 = vld [vmem:[#allocation3 + $0x580] sm:$0xff] }
 0x6c5   :  { %1080 = vmatmul.mubr.bf16.vlgmr.msra.gmra.mrb[20].mxu1 %v1003_v21  ;;  %1996 = vmatmul.mubr.bf16.vlgmr.msra.gmra.mrb[24].mxu0 %v1003_v21  ;;  %v1287_v21 = vld [vmem:[#allocation3 + $0x590] sm:$0xff] }
 0x6c6   :  { %1215 = vmatprep.mubr.bf16.mxu1 %v2244_v19  ;;  %2015 = vmatprep.mubr.msk.bf16.mxu0 %vm2243_vm0, %v2242_v5 }
 0x6c7   :  { %1184 = vmatpush1.bf16.msra.mxu1 %v1141_v23  ;;  %2000 = vmatpush3.bf16.msra.mxu0 %v1143_v24  ;;  %v1288_v23 = vld [vmem:[#allocation3 + $0x598] sm:$0xff]  ;;  %v1290_v24 = vld [vmem:[#allocation3 + $0x5a8] sm:$0xff] }
 0x6c8   :  { %2001 = vmatprep.subr.bf16.mxu0 %v2242_v5  ;;  %1185 = vmatprep.subr.bf16.mxu1 %v1145_v25  ;;  %v1289_v25 = vld [vmem:[#allocation3 + $0x5a0] sm:$0xff] }
 0x6cb   :  { %1186 = vmatpush1.bf16.msra.mxu1 %v1144_v26  ;;  %2002 = vmatpush3.bf16.msra.mxu0 %v1146_v27  ;;  %v1291_v26 = vld [vmem:[#allocation3 + $0x5b0] sm:$0xff]  ;;  %v1293_v27 = vld [vmem:[#allocation3 + $0x5c0] sm:$0xff] }
 0x6cc   :  { %2003 = vmatprep.subr.bf16.mxu0 %v2242_v5  ;;  %1187 = vmatprep.subr.bf16.mxu1 %v1148_v28  ;;  %v1292_v28 = vld [vmem:[#allocation3 + $0x5b8] sm:$0xff] }
 0x6cf   :  { %1188 = vmatpush1.bf16.msra.mxu1 %v1147_v29  ;;  %2004 = vmatpush3.bf16.msra.mxu0 %v1149_v30  ;;  %v1294_v29 = vld [vmem:[#allocation3 + $0x5c8] sm:$0xff]  ;;  %v1296_v30 = vld [vmem:[#allocation3 + $0x5d8] sm:$0xff] }
 0x6d0   :  { %2005 = vmatprep.subr.bf16.mxu0 %v2242_v5  ;;  %1189 = vmatprep.subr.bf16.mxu1 %v1151_v31  ;;  %v1295_v31 = vld [vmem:[#allocation3 + $0x5d0] sm:$0xff] }
 0x6d3   :  { %1190 = vmatpush1.bf16.msra.mxu1 %v1150_v32  ;;  %2006 = vmatpush3.bf16.msra.mxu0 %v1152_v33  ;;  %v1297_v32 = vld [vmem:[#allocation3 + $0x5e0] sm:$0xff]  ;;  %v1299_v33 = vld [vmem:[#allocation3 + $0x5f0] sm:$0xff] }
 0x6d4   :  { %2007 = vmatprep.subr.bf16.mxu0 %v2242_v5  ;;  %1191 = vmatprep.subr.bf16.mxu1 %v1154_v34  ;;  %v1298_v34 = vld [vmem:[#allocation3 + $0x5e8] sm:$0xff] }
 0x6d7   :  { %1192 = vmatpush1.bf16.msra.mxu1 %v1153_v35  ;;  %2008 = vmatpush3.bf16.msra.mxu0 %v1155_v36  ;;  %v1300_v35 = vld [vmem:[#allocation3 + $0x5f8] sm:$0xff]  ;;  %v1166_v36 = vld [vmem:[#allocation4 + $0x12] sm:$0x7] }
 0x6d8   :  { %2009 = vmatprep.subr.bf16.mxu0 %v2242_v5  ;;  %1193 = vmatprep.subr.bf16.mxu1 %v1157_v38  ;;  %v1171_v38 = vrot.slane %v1166_v36, %v2386_v37 }
 0x6db   :  { %1194 = vmatpush1.bf16.msra.mxu1 %v1156_v39  ;;  %2010 = vmatpush3.bf16.msra.mxu0 %v1158_v40 }
 0x6dc   :  { %2011 = vmatprep.subr.bf16.mxu0 %v2242_v5  ;;  %1195 = vmatprep.subr.bf16.mxu1 %v1160_v41 }
 0x6df   :  { %1196 = vmatpush1.bf16.msra.mxu1 %v1159_v42  ;;  %2012 = vmatpush3.bf16.msra.mxu0 %v1161_v43 }
 0x6e0   :  { %2013 = vmatprep.subr.bf16.mxu0 %v2242_v5  ;;  %1197 = vmatprep.subr.bf16.mxu1 %v1163_v44 }
 0x6e3   :  { %1198 = vmatpush1.bf16.msra.mxu1 %v1162_v45  ;;  %2014 = vmatpush3.bf16.msra.mxu0 %v1164_v46 }
 0x6e4   :  { %2019 = vmatprep.subr.bf16.mxu0 %v2242_v5  ;;  %1319 = vmatprep.subr.bf16.mxu1 %v1278_v11  ;;  %v1422_v11 = vld [vmem:[#allocation3 + $0x648] sm:$0xff] }
 0x798   :  { %v1081_v49 = vpop.f32.mrb[20].mxu1  ;;  %v1122_v50 = vpop.f32.mrb[24].mxu0 }
 0x799   :  { %v1082_v52 = vadd.f32 %v1081_v49, %v1035_v48  ;;  %v1083_v53 = vpop.f32.mrb[21].mxu1  ;;  %v1997_v55 = vpop.f32.mrb[25].mxu0  ;;  %v1123_v4 = vadd.f32 %v1122_v50, %v1043_v1  ;;  %v1413_v1 = vld [vmem:[#allocation3 + $0x600] sm:$0xff] }
 0x79a   :  { %v1085_v56 = vpop.f32.mrb[22].mxu1  ;;  %v1125_v57 = vpop.f32.mrb[26].mxu0  ;;  %v1084_v0 = vadd.f32 %v1083_v53, %v1039_v63  ;;  %v1179_v55 = vrot.slane %v1166_v36, %v2392_v54 }
 0x79b   :  { %v1752_v58 = vmul.f32 -1.442695, %v1082_v52  ;;  %v1086_v59 = vpop.f32.mrb[23].mxu1  ;;  %v1998_v60 = vpop.f32.mrb[27].mxu0  ;;  %v1175_v52 = vrot.slane %v1166_v36, %v2389_v51 }
 0x79c   :  { %v1134_v2 = vmax.f32 %v1084_v0, 0.0  ;;  %v1414_v0 = vld [vmem:[#allocation3 + $0x608] sm:$0xff] }
 0x79d   :  { %2128 = vpow2.f32 %v1752_v58 }
 0x7a7   :  { %v2129_v61 = vpop.eup %2128 }
 0x7a8   :  { %v1131_v62 = vadd.f32 1.0, %v2129_v61 }
 0x7aa   :  { %2130 = vrcp.f32 %v1131_v62 }
 0x7b4   :  { %v2131_v3 = vpop.eup %2130 }
 0x7b5   :  { %v1136_v6 = vsub.f32 1.0, %v2131_v3  ;;  %v1135_v7 = vmul.f32 %v2131_v3, %v1134_v2  ;;  %v1415_v2 = vld [vmem:[#allocation3 + $0x610] sm:$0xff]  ;;  %v1417_v3 = vld [vmem:[#allocation3 + $0x620] sm:$0xff] }
 0x7b7   :  { %v1137_v8 = vmul.f32 %v1136_v6, %v1123_v4  ;;  %v1416_v4 = vld [vmem:[#allocation3 + $0x618] sm:$0xff]  ;;  %v1418_v6 = vld [vmem:[#allocation3 + $0x628] sm:$0xff] }
 0x7b9   :  { %v1138_v9 = vadd.f32 %v1137_v8, %v1135_v7  ;;  %v1420_v7 = vld [vmem:[#allocation3 + $0x638] sm:$0xff]  ;;  %v1419_v8 = vld [vmem:[#allocation3 + $0x630] sm:$0xff] }
 0x7bb   :  { %v1139_v10 = vpack.c.bf16 %v1138_v9, %v1138_v9  ;;  %v1421_v9 = vld [vmem:[#allocation3 + $0x640] sm:$0xff] }
 0x7bd   :  { %1216 = vmatmul.mubr.bf16.vlgmr.msra.gmra.mrb[24].mxu1 %v1139_v10  ;;  %2016 = vmatmul.mubr.bf16.vlgmr.msra.gmra.mrb[28].mxu0 %v1139_v10  ;;  %v1423_v10 = vld [vmem:[#allocation3 + $0x650] sm:$0xff] }
 0x7be   :  { %1351 = vmatprep.mubr.bf16.mxu1 %v2244_v19  ;;  %2035 = vmatprep.mubr.msk.bf16.mxu0 %vm2243_vm0, %v2242_v5 }
 0x7bf   :  { %1320 = vmatpush1.bf16.msra.mxu1 %v1277_v12  ;;  %2020 = vmatpush3.bf16.msra.mxu0 %v1279_v13  ;;  %v1424_v12 = vld [vmem:[#allocation3 + $0x658] sm:$0xff]  ;;  %v1426_v13 = vld [vmem:[#allocation3 + $0x668] sm:$0xff] }
 0x7c0   :  { %2021 = vmatprep.subr.bf16.mxu0 %v2242_v5  ;;  %1321 = vmatprep.subr.bf16.mxu1 %v1281_v14  ;;  %v1425_v14 = vld [vmem:[#allocation3 + $0x660] sm:$0xff] }
 0x7c3   :  { %1322 = vmatpush1.bf16.msra.mxu1 %v1280_v15  ;;  %2022 = vmatpush3.bf16.msra.mxu0 %v1282_v16  ;;  %v1427_v15 = vld [vmem:[#allocation3 + $0x670] sm:$0xff]  ;;  %v1429_v16 = vld [vmem:[#allocation3 + $0x680] sm:$0xff] }
 0x7c4   :  { %2023 = vmatprep.subr.bf16.mxu0 %v2242_v5  ;;  %1323 = vmatprep.subr.bf16.mxu1 %v1284_v17  ;;  %v1428_v17 = vld [vmem:[#allocation3 + $0x678] sm:$0xff] }
 0x7c7   :  { %1324 = vmatpush1.bf16.msra.mxu1 %v1283_v18  ;;  %2024 = vmatpush3.bf16.msra.mxu0 %v1285_v20  ;;  %v1430_v18 = vld [vmem:[#allocation3 + $0x688] sm:$0xff]  ;;  %v1432_v20 = vld [vmem:[#allocation3 + $0x698] sm:$0xff] }
 0x7c8   :  { %2025 = vmatprep.subr.bf16.mxu0 %v2242_v5  ;;  %1325 = vmatprep.subr.bf16.mxu1 %v1287_v21  ;;  %v1431_v21 = vld [vmem:[#allocation3 + $0x690] sm:$0xff] }
 0x7cb   :  { %1326 = vmatpush1.bf16.msra.mxu1 %v1286_v22  ;;  %2026 = vmatpush3.bf16.msra.mxu0 %v1288_v23  ;;  %v1433_v22 = vld [vmem:[#allocation3 + $0x6a0] sm:$0xff]  ;;  %v1435_v23 = vld [vmem:[#allocation3 + $0x6b0] sm:$0xff] }
 0x7cc   :  { %2027 = vmatprep.subr.bf16.mxu0 %v2242_v5  ;;  %1327 = vmatprep.subr.bf16.mxu1 %v1290_v24  ;;  %v1434_v24 = vld [vmem:[#allocation3 + $0x6a8] sm:$0xff] }
 0x7cf   :  { %1328 = vmatpush1.bf16.msra.mxu1 %v1289_v25  ;;  %2028 = vmatpush3.bf16.msra.mxu0 %v1291_v26  ;;  %v1436_v25 = vld [vmem:[#allocation3 + $0x6b8] sm:$0xff]  ;;  %v1302_v26 = vld [vmem:[#allocation4 + $0x15] sm:$0x7] }
 0x7d0   :  { %2029 = vmatprep.subr.bf16.mxu0 %v2242_v5  ;;  %1329 = vmatprep.subr.bf16.mxu1 %v1293_v27  ;;  %v1307_v27 = vrot.slane %v1302_v26, %v2386_v37 }
 0x7d3   :  { %1330 = vmatpush1.bf16.msra.mxu1 %v1292_v28  ;;  %2030 = vmatpush3.bf16.msra.mxu0 %v1294_v29 }
 0x7d4   :  { %2031 = vmatprep.subr.bf16.mxu0 %v2242_v5  ;;  %1331 = vmatprep.subr.bf16.mxu1 %v1296_v30 }
 0x7d7   :  { %1332 = vmatpush1.bf16.msra.mxu1 %v1295_v31  ;;  %2032 = vmatpush3.bf16.msra.mxu0 %v1297_v32 }
 0x7d8   :  { %2033 = vmatprep.subr.bf16.mxu0 %v2242_v5  ;;  %1333 = vmatprep.subr.bf16.mxu1 %v1299_v33 }
 0x7db   :  { %1334 = vmatpush1.bf16.msra.mxu1 %v1298_v34  ;;  %2034 = vmatpush3.bf16.msra.mxu0 %v1300_v35 }
 0x7dc   :  { %2039 = vmatprep.subr.bf16.mxu0 %v2242_v5  ;;  %1455 = vmatprep.subr.bf16.mxu1 %v1414_v0  ;;  %v1560_v0 = vld [vmem:[#allocation3 + $0x718] sm:$0xff] }
 0x890   :  { %v1217_v39 = vpop.f32.mrb[24].mxu1  ;;  %v1258_v40 = vpop.f32.mrb[28].mxu0 }
 0x891   :  { %v1218_v41 = vadd.f32 %v1217_v39, %v1171_v38  ;;  %v1219_v42 = vpop.f32.mrb[25].mxu1  ;;  %v2017_v43 = vpop.f32.mrb[29].mxu0  ;;  %v1259_v58 = vadd.f32 %v1258_v40, %v1179_v55  ;;  %v1549_v55 = vld [vmem:[#allocation3 + $0x6c0] sm:$0xff] }
 0x892   :  { %v1221_v44 = vpop.f32.mrb[26].mxu1  ;;  %v1261_v45 = vpop.f32.mrb[30].mxu0  ;;  %v1220_v53 = vadd.f32 %v1219_v42, %v1175_v52  ;;  %v1315_v43 = vrot.slane %v1302_v26, %v2392_v54 }
 0x893   :  { %v1753_v46 = vmul.f32 -1.442695, %v1218_v41  ;;  %v1222_v47 = vpop.f32.mrb[27].mxu1  ;;  %v2018_v48 = vpop.f32.mrb[31].mxu0  ;;  %v1311_v41 = vrot.slane %v1302_v26, %v2389_v51 }
 0x894   :  { %v1270_v56 = vmax.f32 %v1220_v53, 0.0  ;;  %v1550_v53 = vld [vmem:[#allocation3 + $0x6c8] sm:$0xff] }
 0x895   :  { %2132 = vpow2.f32 %v1753_v46 }
 0x89f   :  { %v2133_v49 = vpop.eup %2132 }
 0x8a0   :  { %v1267_v50 = vadd.f32 1.0, %v2133_v49 }
 0x8a2   :  { %2134 = vrcp.f32 %v1267_v50 }
 0x8ac   :  { %v2135_v57 = vpop.eup %2134 }
 0x8ad   :  { %v1272_v59 = vsub.f32 1.0, %v2135_v57  ;;  %v1271_v60 = vmul.f32 %v2135_v57, %v1270_v56  ;;  %v1551_v56 = vld [vmem:[#allocation3 + $0x6d0] sm:$0xff]  ;;  %v1553_v57 = vld [vmem:[#allocation3 + $0x6e0] sm:$0xff] }
 0x8af   :  { %v1273_v61 = vmul.f32 %v1272_v59, %v1259_v58  ;;  %v1552_v58 = vld [vmem:[#allocation3 + $0x6d8] sm:$0xff]  ;;  %v1554_v59 = vld [vmem:[#allocation3 + $0x6e8] sm:$0xff] }
 0x8b1   :  { %v1274_v62 = vadd.f32 %v1273_v61, %v1271_v60  ;;  %v1555_v60 = vld [vmem:[#allocation3 + $0x6f0] sm:$0xff]  ;;  %v1557_v61 = vld [vmem:[#allocation3 + $0x700] sm:$0xff] }
 0x8b3   :  { %v1275_v63 = vpack.c.bf16 %v1274_v62, %v1274_v62  ;;  %v1559_v62 = vld [vmem:[#allocation3 + $0x710] sm:$0xff] }
 0x8b5   :  { %1352 = vmatmul.mubr.bf16.vlgmr.msra.gmra.mrb[28].mxu1 %v1275_v63  ;;  %2036 = vmatmul.mubr.bf16.vlgmr.msra.gmra.mrb[32].mxu0 %v1275_v63  ;;  %v1558_v63 = vld [vmem:[#allocation3 + $0x708] sm:$0xff] }
 0x8b6   :  { %1487 = vmatprep.mubr.bf16.mxu1 %v2244_v19  ;;  %2055 = vmatprep.mubr.msk.bf16.mxu0 %vm2243_vm0, %v2242_v5 }
 0x8b7   :  { %1456 = vmatpush1.bf16.msra.mxu1 %v1413_v1  ;;  %2040 = vmatpush3.bf16.msra.mxu0 %v1415_v2  ;;  %v1562_v1 = vld [vmem:[#allocation3 + $0x728] sm:$0xff]  ;;  %v1561_v2 = vld [vmem:[#allocation3 + $0x720] sm:$0xff] }
 0x8b8   :  { %2041 = vmatprep.subr.bf16.mxu0 %v2242_v5  ;;  %1457 = vmatprep.subr.bf16.mxu1 %v1417_v3  ;;  %v1563_v3 = vld [vmem:[#allocation3 + $0x730] sm:$0xff] }
 0x8bb   :  { %1458 = vmatpush1.bf16.msra.mxu1 %v1416_v4  ;;  %2042 = vmatpush3.bf16.msra.mxu0 %v1418_v6  ;;  %v1565_v4 = vld [vmem:[#allocation3 + $0x740] sm:$0xff]  ;;  %v1564_v6 = vld [vmem:[#allocation3 + $0x738] sm:$0xff] }
 0x8bc   :  { %2043 = vmatprep.subr.bf16.mxu0 %v2242_v5  ;;  %1459 = vmatprep.subr.bf16.mxu1 %v1420_v7  ;;  %v1566_v7 = vld [vmem:[#allocation3 + $0x748] sm:$0xff] }
 0x8bf   :  { %1460 = vmatpush1.bf16.msra.mxu1 %v1419_v8  ;;  %2044 = vmatpush3.bf16.msra.mxu0 %v1421_v9  ;;  %v1568_v8 = vld [vmem:[#allocation3 + $0x758] sm:$0xff]  ;;  %v1567_v9 = vld [vmem:[#allocation3 + $0x750] sm:$0xff] }
 0x8c0   :  { %2045 = vmatprep.subr.bf16.mxu0 %v2242_v5  ;;  %1461 = vmatprep.subr.bf16.mxu1 %v1423_v10  ;;  %v1569_v10 = vld [vmem:[#allocation3 + $0x760] sm:$0xff] }
 0x8c3   :  { %1462 = vmatpush1.bf16.msra.mxu1 %v1422_v11  ;;  %2046 = vmatpush3.bf16.msra.mxu0 %v1424_v12  ;;  %v1571_v11 = vld [vmem:[#allocation3 + $0x770] sm:$0xff]  ;;  %v1570_v12 = vld [vmem:[#allocation3 + $0x768] sm:$0xff] }
 0x8c4   :  { %2047 = vmatprep.subr.bf16.mxu0 %v2242_v5  ;;  %1463 = vmatprep.subr.bf16.mxu1 %v1426_v13  ;;  %v1572_v13 = vld [vmem:[#allocation3 + $0x778] sm:$0xff] }
 0x8c7   :  { %1464 = vmatpush1.bf16.msra.mxu1 %v1425_v14  ;;  %2048 = vmatpush3.bf16.msra.mxu0 %v1427_v15  ;;  %v1438_v14 = vld [vmem:[#allocation4 + $0x18] sm:$0x7] }
 0x8c8   :  { %2049 = vmatprep.subr.bf16.mxu0 %v2242_v5  ;;  %1465 = vmatprep.subr.bf16.mxu1 %v1429_v16  ;;  %v1443_v15 = vrot.slane %v1438_v14, %v2386_v37 }
 0x8cb   :  { %1466 = vmatpush1.bf16.msra.mxu1 %v1428_v17  ;;  %2050 = vmatpush3.bf16.msra.mxu0 %v1430_v18 }
 0x8cc   :  { %2051 = vmatprep.subr.bf16.mxu0 %v2242_v5  ;;  %1467 = vmatprep.subr.bf16.mxu1 %v1432_v20 }
 0x8cf   :  { %1468 = vmatpush1.bf16.msra.mxu1 %v1431_v21  ;;  %2052 = vmatpush3.bf16.msra.mxu0 %v1433_v22 }
 0x8d0   :  { %2053 = vmatprep.subr.bf16.mxu0 %v2242_v5  ;;  %1469 = vmatprep.subr.bf16.mxu1 %v1435_v23 }
 0x8d3   :  { %1470 = vmatpush1.bf16.msra.mxu1 %v1434_v24  ;;  %2054 = vmatpush3.bf16.msra.mxu0 %v1436_v25 }
 0x8d4   :  { %2059 = vmatprep.subr.bf16.mxu0 %v2242_v5  ;;  %1591 = vmatprep.subr.bf16.mxu1 %v1550_v53 }
 0x988   :  { %v1353_v28 = vpop.f32.mrb[28].mxu1  ;;  %v1394_v29 = vpop.f32.mrb[32].mxu0 }
 0x989   :  { %v1354_v30 = vadd.f32 %v1353_v28, %v1307_v27  ;;  %v1355_v31 = vpop.f32.mrb[29].mxu1  ;;  %v2037_v32 = vpop.f32.mrb[33].mxu0  ;;  %v1395_v46 = vadd.f32 %v1394_v29, %v1315_v43  ;;  %v1447_v28 = vrot.slane %v1438_v14, %v2389_v51 }
 0x98a   :  { %v1357_v33 = vpop.f32.mrb[30].mxu1  ;;  %v1397_v34 = vpop.f32.mrb[34].mxu0  ;;  %v1356_v42 = vadd.f32 %v1355_v31, %v1311_v41 }
 0x98b   :  { %v1754_v35 = vmul.f32 -1.442695, %v1354_v30  ;;  %v1358_v36 = vpop.f32.mrb[31].mxu1  ;;  %v2038_v38 = vpop.f32.mrb[35].mxu0  ;;  %v1451_v30 = vrot.slane %v1438_v14, %v2392_v54 }
 0x98c   :  { %v1406_v44 = vmax.f32 %v1356_v42, 0.0 }
 0x98d   :  { %2136 = vpow2.f32 %v1754_v35 }
 0x997   :  { %v2137_v39 = vpop.eup %2136 }
 0x998   :  { %v1403_v40 = vadd.f32 1.0, %v2137_v39 }
 0x99a   :  { %2138 = vrcp.f32 %v1403_v40  ;;  %v1574_v40 = vld [vmem:[#allocation4 + $0x1b] sm:$0x7] }
 0x99b   :  { %v1579_v41 = vrot.slane %v1574_v40, %v2386_v37 }
 0x9a4   :  { %v2139_v45 = vpop.eup %2138 }
 0x9a5   :  { %v1408_v47 = vsub.f32 1.0, %v2139_v45  ;;  %v1407_v48 = vmul.f32 %v2139_v45, %v1406_v44 }
 0x9a7   :  { %v1409_v49 = vmul.f32 %v1408_v47, %v1395_v46 }
 0x9a9   :  { %v1410_v50 = vadd.f32 %v1409_v49, %v1407_v48 }
 0x9ab   :  { %v1411_v52 = vpack.c.bf16 %v1410_v50, %v1410_v50 }
 0x9ad   :  { %1488 = vmatmul.mubr.bf16.vlgmr.msra.gmra.mrb[32].mxu1 %v1411_v52  ;;  %2056 = vmatmul.mubr.bf16.vlgmr.msra.gmra.mrb[36].mxu0 %v1411_v52 }
 0x9ae   :  { %1623 = vmatprep.mubr.bf16.mxu1 %v2244_v19  ;;  %2075 = vmatprep.mubr.msk.bf16.mxu0 %vm2243_vm0, %v2242_v5  ;;  %v1556_v19 = vld [vmem:[#allocation3 + $0x6f8] sm:$0xff] }
 0x9af   :  { %1592 = vmatpush1.bf16.msra.mxu1 %v1549_v55  ;;  %2060 = vmatpush3.bf16.msra.mxu0 %v1551_v56  ;;  %v1583_v56 = vrot.slane %v1574_v40, %v2389_v51 }
 0x9b0   :  { %2061 = vmatprep.subr.bf16.mxu0 %v2242_v5  ;;  %1593 = vmatprep.subr.bf16.mxu1 %v1553_v57 }
 0x9b3   :  { %1594 = vmatpush1.bf16.msra.mxu1 %v1552_v58  ;;  %2062 = vmatpush3.bf16.msra.mxu0 %v1554_v59  ;;  %v1587_v58 = vrot.slane %v1574_v40, %v2392_v54 }
 0x9b4   :  { %2063 = vmatprep.subr.bf16.mxu0 %v2242_v5  ;;  %1595 = vmatprep.subr.bf16.mxu1 %v1556_v19 }
 0x9b7   :  { %1596 = vmatpush1.bf16.msra.mxu1 %v1555_v60  ;;  %2064 = vmatpush3.bf16.msra.mxu0 %v1557_v61 }
 0x9b8   :  { %2065 = vmatprep.subr.bf16.mxu0 %v2242_v5  ;;  %1597 = vmatprep.subr.bf16.mxu1 %v1559_v62 }
 0x9bb   :  { %1598 = vmatpush1.bf16.msra.mxu1 %v1558_v63  ;;  %2066 = vmatpush3.bf16.msra.mxu0 %v1560_v0 }
 0x9bc   :  { %2067 = vmatprep.subr.bf16.mxu0 %v2242_v5  ;;  %1599 = vmatprep.subr.bf16.mxu1 %v1562_v1 }
 0x9bf   :  { %1600 = vmatpush1.bf16.msra.mxu1 %v1561_v2  ;;  %2068 = vmatpush3.bf16.msra.mxu0 %v1563_v3 }
 0x9c0   :  { %2069 = vmatprep.subr.bf16.mxu0 %v2242_v5  ;;  %1601 = vmatprep.subr.bf16.mxu1 %v1565_v4 }
 0x9c3   :  { %1602 = vmatpush1.bf16.msra.mxu1 %v1564_v6  ;;  %2070 = vmatpush3.bf16.msra.mxu0 %v1566_v7 }
 0x9c4   :  { %2071 = vmatprep.subr.bf16.mxu0 %v2242_v5  ;;  %1603 = vmatprep.subr.bf16.mxu1 %v1568_v8 }
 0x9c7   :  { %1604 = vmatpush1.bf16.msra.mxu1 %v1567_v9  ;;  %2072 = vmatpush3.bf16.msra.mxu0 %v1569_v10 }
 0x9c8   :  { %2073 = vmatprep.subr.bf16.mxu0 %v2242_v5  ;;  %1605 = vmatprep.subr.bf16.mxu1 %v1571_v11 }
 0x9cb   :  { %1606 = vmatpush1.bf16.msra.mxu1 %v1570_v12  ;;  %2074 = vmatpush3.bf16.msra.mxu0 %v1572_v13 }
 0xa80   :  { %v1489_v16 = vpop.f32.mrb[32].mxu1  ;;  %v1530_v17 = vpop.f32.mrb[36].mxu0 }
 0xa81   :  { %v1490_v18 = vadd.f32 %v1489_v16, %v1443_v15  ;;  %v1491_v20 = vpop.f32.mrb[33].mxu1  ;;  %v2057_v21 = vpop.f32.mrb[37].mxu0  ;;  %v1531_v33 = vadd.f32 %v1530_v17, %v1451_v30 }
 0xa82   :  { %v1493_v22 = vpop.f32.mrb[34].mxu1  ;;  %v1533_v23 = vpop.f32.mrb[38].mxu0  ;;  %v1492_v29 = vadd.f32 %v1491_v20, %v1447_v28 }
 0xa83   :  { %v1755_v24 = vmul.f32 -1.442695, %v1490_v18  ;;  %v1494_v25 = vpop.f32.mrb[35].mxu1  ;;  %v2058_v26 = vpop.f32.mrb[39].mxu0 }
 0xa84   :  { %v1542_v31 = vmax.f32 %v1492_v29, 0.0 }
 0xa85   :  { %2140 = vpow2.f32 %v1755_v24 }
 0xa8f   :  { %v2141_v5 = vpop.eup %2140 }
 0xa90   :  { %v1539_v27 = vadd.f32 1.0, %v2141_v5 }
 0xa92   :  { %2142 = vrcp.f32 %v1539_v27 }
 0xa9c   :  { %v2143_v32 = vpop.eup %2142 }
 0xa9d   :  { %v1544_v34 = vsub.f32 1.0, %v2143_v32  ;;  %v1543_v35 = vmul.f32 %v2143_v32, %v1542_v31 }
 0xa9f   :  { %v1545_v36 = vmul.f32 %v1544_v34, %v1531_v33 }
 0xaa1   :  { %v1546_v38 = vadd.f32 %v1545_v36, %v1543_v35 }
 0xaa3   :  { %v1547_v39 = vpack.c.bf16 %v1546_v38, %v1546_v38 }
 0xaa5   :  { %1624 = vmatmul.mubr.bf16.vlgmr.msra.gmra.mrb[36].mxu1 %v1547_v39  ;;  %2076 = vmatmul.mubr.bf16.vlgmr.msra.gmra.mrb[40].mxu0 %v1547_v39 }
 0xb78   :  { %v1625_v42 = vpop.f32.mrb[36].mxu1  ;;  %v1666_v43 = vpop.f32.mrb[40].mxu0 }
 0xb79   :  { %v1626_v44 = vadd.f32 %v1625_v42, %v1579_v41  ;;  %v1627_v45 = vpop.f32.mrb[37].mxu1  ;;  %v2077_v46 = vpop.f32.mrb[41].mxu0  ;;  %v1667_v19 = vadd.f32 %v1666_v43, %v1587_v58 }
 0xb7a   :  { %v1629_v47 = vpop.f32.mrb[38].mxu1  ;;  %v1669_v48 = vpop.f32.mrb[42].mxu0  ;;  %v1628_v57 = vadd.f32 %v1627_v45, %v1583_v56 }
 0xb7b   :  { %v1756_v49 = vmul.f32 -1.442695, %v1626_v44  ;;  %v1630_v50 = vpop.f32.mrb[39].mxu1  ;;  %v2078_v52 = vpop.f32.mrb[43].mxu0 }
 0xb7c   :  { %v1678_v37 = vmax.f32 %v1628_v57, 0.0 }
 0xb7d   :  { %2144 = vpow2.f32 %v1756_v49 }
 0xb87   :  { %v2145_v53 = vpop.eup %2144 }
 0xb88   :  { %v1675_v55 = vadd.f32 1.0, %v2145_v53 }
 0xb8a   :  { %2146 = vrcp.f32 %v1675_v55 }
 0xb94   :  { %v2147_v59 = vpop.eup %2146 }
 0xb95   :  { %v1680_v60 = vsub.f32 1.0, %v2147_v59  ;;  %v1679_v61 = vmul.f32 %v2147_v59, %v1678_v37 }
 0xb97   :  { %v1681_v62 = vmul.f32 %v1680_v60, %v1667_v19 }
 0xb99   :  { %v1682_v63 = vadd.f32 %v1681_v62, %v1679_v61 }
 0xb9b   :  { %v1757_v0 = vmul.f32 -1.442695, %v1682_v63 }
 0xb9d   :  { %2148 = vpow2.f32 %v1757_v0 }
 0xba7   :  { %v2149_v1 = vpop.eup %2148 }
 0xba8   :  { %v1686_v2 = vadd.f32 1.0, %v2149_v1 }
 0xbaa   :  { %2150 = vrcp.f32 %v1686_v2 }
 0xbb4   :  { %v2151_v3 = vpop.eup %2150 }
 0xbb5   :  { %1689 = vst [vmem:[#allocation11] sm:$0xff] %v2151_v3 }
 0xbb6   :  { %2207 = shalt.err (!%p2204_p6)
}
 0xbb7   :  { %s2208_s16 = scalar_lea.hbm %s2529_s8, 128 }
 0xbb8   :  { %p2209_p7 = scmp.ne.s32.totalorder %s2529_s8, %s2208_s16  ;;  %p2212_p8 = scmp.lt.u32.totalorder %s2208_s16, %s2529_s8 }
 0xbba   :  { %p2214_p9 = pnand %p2212_p8, %p2209_p7 }
 0xbbc   :  { %2217 = shalt.err (!%p2214_p9)
}
 0xbbd   :  { %1699 = dma.vmem_to_hbm [thread:$0]  %s1697_s5, 128, %s2529_s8, [#allocation8]  }
 0xbbe   :  { %2226 = dma.done.wait [#allocation8], 128  }
 0xbbf   :  { %2227 = vsyncadd [#allocation8], 4294967168 }
 0xbc0   :  { %1703 = vsyncpa [#allocation7], 1 }
 0xbc1   :  { %1704 = vsyncpa [#allocation10], 1 }
 0xbc2   :  { %1705 = vsyncpa [#allocation8], 1 }
 0xbc3   :  { %1706 = vsyncmov [#allocation5] }
 0xbc6   :  { %s1707_s21 = vpop.sfrf %1706 }
 0xbc7   :  { %p1758_p10 = scmp.ne.s32.totalorder %s1707_s21, 0 }
 0xbc9   :  { %1711 = shalt.err (%p1758_p10)  }
 0xbca   :  { %1713 = vsyncmov [#allocation5 + $0x1] }
 0xbcd   :  { %s1714_s22 = vpop.sfrf %1713 }
 0xbce   :  { %p1759_p11 = scmp.ne.s32.totalorder %s1714_s22, 0 }
 0xbd0   :  { %1718 = shalt.err (%p1759_p11)  }

</bundles_post_ra>
